<compile_context>
chip_gen: v6e
topology: v6e:2x2x1
jax: 0.10.0
libtpu: 0.0.40
codegen_flags: <defaults>
</compile_context>

<pallas_src>
import functools

import numpy as np
import jax
import jax.numpy as jnp
from jax.experimental import pallas as pl
from jax.experimental.pallas import tpu as pltpu

RELU6_MAX = 6.0
FUSE_EPS = 1e-8
BN_EPS = 1e-5


# ------------------------------------------------------------------
# operator-matrix construction (static numpy, host side)
# ------------------------------------------------------------------
def _adaptive_pool_matrix(out_size, in_size):
    """Row-stochastic matrix implementing torch AdaptiveAvgPool1d semantics."""
    m = np.zeros((out_size, in_size), dtype=np.float32)
    for i in range(out_size):
        start = (i * in_size) // out_size
        end = -((-(i + 1) * in_size) // out_size)  # ceil((i+1)*in/out)
        m[i, start:end] = 1.0 / float(end - start)
    return m


def _bilinear_matrix(out_size, in_size):
    """1-D bilinear interpolation matrix, align_corners=False (torch F.interpolate)."""
    m = np.zeros((out_size, in_size), dtype=np.float32)
    scale = in_size / out_size
    for i in range(out_size):
        src = scale * (i + 0.5) - 0.5
        if src < 0.0:
            src = 0.0
        i0 = int(np.floor(src))
        if i0 > in_size - 1:
            i0 = in_size - 1
        i1 = i0 + 1 if i0 < in_size - 1 else i0
        lam = src - i0
        m[i, i0] += 1.0 - lam
        m[i, i1] += lam
    return m


def build_operators(H, W, pool_scales):
    """Contraction-major, lane-padded pooling (P) and upsampling (L) operators.

    P[k] : (HW, S2p)   used as  pooled = y @ P[k]
    L[k] : (S2p, HW)   used as  up     = z @ L[k]
    S2p = max(s)^2 rounded up to a multiple of 128 (169 -> 256).  Padded
    columns of P are zero, so padded pooled entries are 0, ReLU6(0)=0, and the
    zero rows of L annihilate them -> padding is exact.
    """
    HW = H * W
    smax2 = max(pool_scales) ** 2
    s2p = max(128, ((smax2 + 127) // 128) * 128)
    n = len(pool_scales)
    P = np.zeros((n, HW, s2p), dtype=np.float32)
    L = np.zeros((n, s2p, HW), dtype=np.float32)
    for k, s in enumerate(pool_scales):
        ph = _adaptive_pool_matrix(s, H)
        pw = _adaptive_pool_matrix(s, W)
        lh = _bilinear_matrix(H, s)
        lw = _bilinear_matrix(W, s)
        P[k, :, : s * s] = np.kron(ph, pw).T
        L[k, : s * s, :] = np.kron(lh, lw).T
    return jnp.asarray(P), jnp.asarray(L)


# ------------------------------------------------------------------
# deterministic parameter init (ConvBNReLU x4 + fuse weights)
# ------------------------------------------------------------------
def init_params(key, dim):
    co = dim // 4
    ks = jax.random.split(key, 5)
    conv_w = 0.2 * jax.random.normal(ks[0], (4, co, dim), dtype=jnp.float32)
    gamma = 1.0 + 0.1 * jax.random.normal(ks[1], (4, co, 1), dtype=jnp.float32)
    beta = 0.1 * jax.random.normal(ks[2], (4, co, 1), dtype=jnp.float32)
    r_mean = 0.1 * jax.random.normal(ks[3], (4, co, 1), dtype=jnp.float32)
    r_var = 1.0 + 0.1 * jax.random.uniform(ks[4], (4, co, 1), dtype=jnp.float32)
    # TODO(synk): BatchNorm reproduced in eval mode (folded running stats);
    # training-mode batch statistics are not reproduced.
    bn_scale = gamma / jnp.sqrt(r_var + BN_EPS)
    bn_shift = beta - r_mean * bn_scale
    fuse_w = jnp.ones((2,), dtype=jnp.float32)  # nn.Parameter(torch.ones(2))
    return dict(conv_w=conv_w, bn_scale=bn_scale, bn_shift=bn_shift, fuse_w=fuse_w)


# ------------------------------------------------------------------
# Pallas kernel: PPooling forward for one (bt, C, HW) batch-block tile
# ------------------------------------------------------------------
def ppooling_kernel(x_ref, w_ref, bias_ref, p_ref, l_ref, fw_ref, out_ref, y_ref,
                    *, co):
    bt, C, HW = x_ref.shape
    n_scales = p_ref.shape[0]          # 3 non-global pool scales
    n_branch = n_scales + 1

    fw0 = fw_ref[0]                    # normalized fuse weights (SMEM scalars)
    fw1 = fw_ref[1]

    w = w_ref[...]                     # (C, C) branch-major 1x1 conv, BN scale folded
    bias = bias_ref[...]               # (C, 1) folded BN shift, f32

    # Fused 1x1 conv per batch element: dense (C, C) weight, MXU matmuls with
    # M=C, K=C, N=HW (no block-diagonal zeros).  Results are scattered
    # branch-major into VMEM scratch so the pool / bilinear matmuls below see
    # contiguous (bt*co, HW) slabs (full MXU row occupancy).
    for b in range(bt):                # static loop, bt is small
        yb = jnp.dot(w, x_ref[b], preferred_element_type=jnp.float32) + bias
        for k in range(n_branch):
            y_ref[k, b * co:(b + 1) * co, :] = yb[k * co:(k + 1) * co, :]

    def store_branch(k, up3):
        # One fused residual store per branch: fw0*x + fw1*ppm_k.  Lane-dense
        # (HW columns); fuse multiplies hoisted out of any per-batch loop; the
        # residual slice is cast at store time (no full-tile f32 x copy).
        res = x_ref[:, k * co:(k + 1) * co, :].astype(jnp.float32)
        out_ref[:, k * co:(k + 1) * co, :] = (fw0 * res + fw1 * up3).astype(out_ref.dtype)

    # branch 0: conv -> BN -> ReLU6 -> global avg pool -> bilinear(1x1->HxW) == broadcast
    y0 = jnp.clip(y_ref[0], 0.0, RELU6_MAX)                 # (bt*co, HW)
    g0 = jnp.mean(y0, axis=1, keepdims=True)                # (bt*co, 1) cross-lane reduce (XLU)
    store_branch(0, g0.reshape(bt, co, 1))                  # broadcasts over lanes

    # branches 1..3: (commuted) conv -> adaptive avg pool -> ReLU6 -> bilinear to (H, W)
    for k in range(n_scales):                               # static loop over 3 scales
        slab = y_ref[k + 1]                                                  # (bt*co, HW) f32
        pooled = jnp.dot(slab.astype(p_ref.dtype), p_ref[k],
                         preferred_element_type=jnp.float32)                 # (bt*co, S2p)
        z = jnp.clip(pooled, 0.0, RELU6_MAX)
        up = jnp.dot(z.astype(l_ref.dtype), l_ref[k],
                     preferred_element_type=jnp.float32)                     # (bt*co, HW)
        store_branch(k + 1, up.reshape(bt, co, HW))


# ------------------------------------------------------------------
# wrapper
# ------------------------------------------------------------------
def _pick_block_batch(B, C, HW, co, in_itemsize, out_itemsize, budget_bytes):
    """Pick the per-grid-step batch block bt so that
       * the double-buffered x/out tiles + f32 working set fit a v7x-safe budget,
       * M = bt*co fills the MXU rows (>=128) where possible,
       * M is a multiple of 8 (sublane-aligned slabs and unmasked stores),
       * the grid keeps >= 2 steps when it can (both v7x TensorCores busy)."""
    def footprint(bt):
        tiles = 2 * bt * C * HW * (in_itemsize + out_itemsize)  # double-buffered in/out
        scratch = bt * C * HW * 4                                # branch-major conv scratch
        work = 8 * bt * co * HW * 4                              # live slabs / pooled / spills
        return tiles + scratch + work

    cands = [d for d in range(1, B + 1) if B % d == 0 and footprint(d) <= budget_bytes]
    if not cands:
        cands = [1]

    def score(bt):
        m = bt * co
        fill = min(m, 128) / 128.0                 # MXU row occupancy of pool/bilinear matmuls
        steps = 1.0 if (B // bt) >= 2 else 0.8     # prefer >=2 grid steps (v7x 2nd core)
        align = 1.0 if m % 8 == 0 else 0.6         # sublane alignment
        return fill * steps * align

    return max(cands, key=lambda bt: (score(bt), bt))


def ppooling_forward(x, params, P, L, *, block_batch=None,
                     compute_dtype=jnp.bfloat16, out_dtype=jnp.float32,
                     vmem_budget_bytes=40 << 20):
    """MXU operands (x tile, fused weight, pool/bilinear operators) are fed in
    `compute_dtype` (default bfloat16 on every generation) with f32
    accumulation and f32 clip / residual / output math.  compute_dtype=float32
    matches the PyTorch module to ~1e-3; out_dtype=bfloat16 halves HBM
    writeback if the caller accepts a bf16 result."""
    B, C, H, W = x.shape
    HW = H * W
    n_scales, HW_p, S2p = P.shape
    n_branch = n_scales + 1
    co = C // n_branch
    assert HW_p == HW and co * n_branch == C
    assert params["conv_w"].shape == (n_branch, co, C)

    # Fold BN (eval) scale into the 1x1 conv weights: a single branch-major
    # (C, C) weight and (C, 1) shift (plain reshapes -- no scatter graph).
    w_fused = (params["conv_w"] * params["bn_scale"]).reshape(C, C)
    bias = params["bn_shift"].reshape(C, 1).astype(jnp.float32)

    # fuse weights (ReLU + normalize) computed once, outside the grid body
    wts = jnp.maximum(params["fuse_w"], 0.0)
    fw = (wts / (jnp.sum(wts) + FUSE_EPS)).astype(jnp.float32)

    in_itemsize = jnp.dtype(compute_dtype).itemsize
    out_itemsize = jnp.dtype(out_dtype).itemsize
    bt = (_pick_block_batch(B, C, HW, co, in_itemsize, out_itemsize, vmem_budget_bytes)
          if block_batch is None else block_batch)
    assert B % bt == 0

    x3 = x.reshape(B, C, HW).astype(compute_dtype)
    wc = w_fused.astype(compute_dtype)
    Pc = P.astype(compute_dtype)
    Lc = L.astype(compute_dtype)

    # Explicit VMEM budget (sized for v7x's 64 MiB physical, fine on v5e/v6e).
    op_bytes = (wc.size + Pc.size + Lc.size) * in_itemsize + bias.size * 4
    tile_bytes = 2 * bt * C * HW * (in_itemsize + out_itemsize)
    scratch_bytes = bt * C * HW * 4
    work_bytes = 8 * bt * co * HW * 4
    vmem_limit = int(min(max(tile_bytes + op_bytes + scratch_bytes + work_bytes,
                             32 << 20), 56 << 20))

    inv = pl.Buffered(1)  # grid-invariant operands: no double-buffering
    kernel = functools.partial(ppooling_kernel, co=co)
    out3 = pl.pallas_call(
        kernel,
        out_shape=jax.ShapeDtypeStruct((B, C, HW), out_dtype),
        grid=(B // bt,),
        in_specs=[
            pl.BlockSpec((bt, C, HW), lambda i: (i, 0, 0)),                         # x tile
            pl.BlockSpec((C, C), lambda i: (0, 0), pipeline_mode=inv),              # fused conv weight
            pl.BlockSpec((C, 1), lambda i: (0, 0), pipeline_mode=inv),              # folded BN shift
            pl.BlockSpec((n_scales, HW, S2p), lambda i: (0, 0, 0), pipeline_mode=inv),  # pooling ops
            pl.BlockSpec((n_scales, S2p, HW), lambda i: (0, 0, 0), pipeline_mode=inv),  # bilinear ops
            pl.BlockSpec(memory_space=pltpu.MemorySpace.SMEM),                      # fuse weights (2,)
        ],
        out_specs=pl.BlockSpec((bt, C, HW), lambda i: (i, 0, 0)),
        scratch_shapes=[pltpu.VMEM((n_branch, bt * co, HW), jnp.float32)],          # branch-major y
        compiler_params=pltpu.CompilerParams(
            dimension_semantics=("parallel",),
            vmem_limit_bytes=vmem_limit),
    )(x3, wc, bias, Pc, Lc, fw)
    return out3.reshape(B, C, H, W)


# ------------------------------------------------------------------
# pure-JAX reference in the ORIGINAL per-branch order (independent of the
# kernel's fusion / commuting / padding rewrites)
# ------------------------------------------------------------------
def ppooling_ref(x, params, pool_scales):
    B, C, H, W = x.shape
    xf = x.reshape(B, C, H * W)
    w = params["conv_w"]
    s = params["bn_scale"]
    b = params["bn_shift"]
    wt = jnp.maximum(params["fuse_w"], 0.0)
    fw = wt / (jnp.sum(wt) + FUSE_EPS)

    parts = []
    # branch 0: conv -> BN -> ReLU6 -> AdaptiveAvgPool2d(1) -> bilinear == broadcast
    y0 = jnp.einsum("oc,bcp->bop", w[0], xf)
    y0 = jnp.clip(y0 * s[0] + b[0], 0.0, RELU6_MAX)
    g0 = jnp.mean(y0, axis=2, keepdims=True)
    parts.append(jnp.broadcast_to(g0, y0.shape))
    # branches 1..3: AdaptiveAvgPool2d(s) -> conv -> BN -> ReLU6 -> bilinear
    for k, sc in enumerate(pool_scales):
        pm = jnp.asarray(np.kron(_adaptive_pool_matrix(sc, H), _adaptive_pool_matrix(sc, W)))
        lm = jnp.asarray(np.kron(_bilinear_matrix(H, sc), _bilinear_matrix(W, sc)))
        pooled = jnp.einsum("bcp,qp->bcq", xf, pm)
        z = jnp.einsum("oc,bcq->boq", w[k + 1], pooled)
        z = jnp.clip(z * s[k + 1] + b[k + 1], 0.0, RELU6_MAX)
        parts.append(jnp.einsum("boq,pq->bop", z, lm))
    ppm = jnp.concatenate(parts, axis=1)
    return (fw[0] * xf + fw[1] * ppm).reshape(B, C, H, W)


if __name__ == "__main__":
    # shapes consistent with PPooling(dim, last_feat_size=16):
    # pool_scales = [1, 5, 9, 13] -> 4 branches, each dim//4 channels -> concat == dim
    B, dim, H, W = 2, 8, 16, 16
    last_feat_size = 16
    pool_scales = list(range(1, last_feat_size, last_feat_size // 4))
    assert len(pool_scales) == 4 and dim % 4 == 0

    key = jax.random.PRNGKey(0)
    kx, kp = jax.random.split(key)
    x = jax.random.normal(kx, (B, dim, H, W), dtype=jnp.float32)
    params = init_params(kp, dim)
    P, L = build_operators(H, W, pool_scales[1:])

    ref = ppooling_ref(x, params, pool_scales[1:])

    # float32 operand path: validates the fusion / commuting / padding math exactly.
    out_f32 = ppooling_forward(x, params, P, L, compute_dtype=jnp.float32)
    out_f32 = jax.block_until_ready(out_f32)
    assert out_f32.shape == x.shape
    np.testing.assert_allclose(np.asarray(out_f32), np.asarray(ref), rtol=1e-3, atol=1e-3)

    # default bfloat16 MXU-operand path (f32 accumulation / residual / output).
    out_bf16 = ppooling_forward(x, params, P, L)
    out_bf16 = jax.block_until_ready(out_bf16)
    assert out_bf16.shape == x.shape
    np.testing.assert_allclose(np.asarray(out_bf16), np.asarray(ref), rtol=5e-2, atol=5e-2)

    print("KERNEL_OK")
</pallas_src>

<mosaic_0001>
module attributes {stable_mosaic.version = 11 : i64} {
  func.func @ppooling_kernel(%arg0: i32, %arg1: memref<2x8x256xf32, #tpu.memory_space<vmem>>, %arg2: memref<8x8xf32, #tpu.memory_space<vmem>>, %arg3: memref<8x1xf32, #tpu.memory_space<vmem>>, %arg4: memref<3x256x256xf32, #tpu.memory_space<vmem>>, %arg5: memref<3x256x256xf32, #tpu.memory_space<vmem>>, %arg6: memref<2xf32, #tpu.memory_space<smem>>, %arg7: memref<2x8x256xf32, #tpu.memory_space<vmem>>, %arg8: memref<4x4x256xf32, #tpu.memory_space<vmem>>) attributes {dimension_semantics = [#tpu.dimension_semantics<parallel>], iteration_bounds = array<i64: 1>, scalar_prefetch = 0 : i64, scratch_operands = 1 : i64, tpu.core_type = #tpu.core_type<tc>, window_params = [{transform_indices = @transform_0, window_bounds = array<i64: 2, 8, 256>}, {pipeline_mode = #tpu.pipeline_mode<synchronous>, transform_indices = @transform_1, window_bounds = array<i64: 8, 8>}, {pipeline_mode = #tpu.pipeline_mode<synchronous>, transform_indices = @transform_2, window_bounds = array<i64: 8, 1>}, {pipeline_mode = #tpu.pipeline_mode<synchronous>, transform_indices = @transform_3, window_bounds = array<i64: 3, 256, 256>}, {pipeline_mode = #tpu.pipeline_mode<synchronous>, transform_indices = @transform_4, window_bounds = array<i64: 3, 256, 256>}, {transform_indices = @transform_5, window_bounds = array<i64: 2>}, {transform_indices = @transform_6, window_bounds = array<i64: 2, 8, 256>}]} {
    %c0 = arith.constant 0 : index
    %0 = memref.load %arg6[%c0] : memref<2xf32, #tpu.memory_space<smem>>
    %c1 = arith.constant 1 : index
    %1 = memref.load %arg6[%c1] : memref<2xf32, #tpu.memory_space<smem>>
    %c0_0 = arith.constant 0 : index
    %c0_1 = arith.constant 0 : index
    %2 = vector.load %arg2[%c0_0, %c0_1] : memref<8x8xf32, #tpu.memory_space<vmem>>, vector<8x8xf32>
    %c0_2 = arith.constant 0 : index
    %c0_3 = arith.constant 0 : index
    %3 = vector.load %arg3[%c0_2, %c0_3] : memref<8x1xf32, #tpu.memory_space<vmem>>, vector<8x1xf32>
    %c0_4 = arith.constant 0 : index
    %c0_5 = arith.constant 0 : index
    %c0_6 = arith.constant 0 : index
    %4 = vector.load %arg1[%c0_4, %c0_5, %c0_6] : memref<2x8x256xf32, #tpu.memory_space<vmem>>, vector<1x8x256xf32>
    %5 = vector.shape_cast %4 : vector<1x8x256xf32> to vector<8x256xf32>
    %cst = arith.constant dense<0.000000e+00> : vector<8x256xf32>
    %6 = tpu.matmul %2, %5, %cst {dimension_numbers = #tpu.dot_dimension_numbers<[1], [0], [0], [1], [0, 0, 1, 1], [], []>} : vector<8x8xf32>, vector<8x256xf32>, vector<8x256xf32> -> vector<8x256xf32>
    %7 = vector.broadcast %3 : vector<8x1xf32> to vector<8x256xf32>
    %8 = arith.addf %6, %7 : vector<8x256xf32>
    %9 = vector.extract_strided_slice %8 {offsets = [0, 0], sizes = [2, 256], strides = [1, 1]} : vector<8x256xf32> to vector<2x256xf32>
    %c0_7 = arith.constant 0 : index
    %c0_8 = arith.constant 0 : index
    %c0_9 = arith.constant 0 : index
    %10 = vector.load %arg8[%c0_7, %c0_8, %c0_9] : memref<4x4x256xf32, #tpu.memory_space<vmem>>, vector<1x2x256xf32>
    %11 = vector.shape_cast %10 : vector<1x2x256xf32> to vector<2x256xf32>
    %12 = vector.shape_cast %9 : vector<2x256xf32> to vector<1x2x256xf32>
    tpu.vector_store %arg8[%c0_7, %c0_8, %c0_9], %12 {strides = array<i32>} : memref<4x4x256xf32, #tpu.memory_space<vmem>>, vector<1x2x256xf32>,
    %13 = vector.extract_strided_slice %8 {offsets = [2, 0], sizes = [2, 256], strides = [1, 1]} : vector<8x256xf32> to vector<2x256xf32>
    %c1_10 = arith.constant 1 : index
    %c0_11 = arith.constant 0 : index
    %c0_12 = arith.constant 0 : index
    %14 = vector.load %arg8[%c1_10, %c0_11, %c0_12] : memref<4x4x256xf32, #tpu.memory_space<vmem>>, vector<1x2x256xf32>
    %15 = vector.shape_cast %14 : vector<1x2x256xf32> to vector<2x256xf32>
    %16 = vector.shape_cast %13 : vector<2x256xf32> to vector<1x2x256xf32>
    tpu.vector_store %arg8[%c1_10, %c0_11, %c0_12], %16 {strides = array<i32>} : memref<4x4x256xf32, #tpu.memory_space<vmem>>, vector<1x2x256xf32>,
    %17 = vector.extract_strided_slice %8 {offsets = [4, 0], sizes = [2, 256], strides = [1, 1]} : vector<8x256xf32> to vector<2x256xf32>
    %c2 = arith.constant 2 : index
    %c0_13 = arith.constant 0 : index
    %c0_14 = arith.constant 0 : index
    %18 = vector.load %arg8[%c2, %c0_13, %c0_14] : memref<4x4x256xf32, #tpu.memory_space<vmem>>, vector<1x2x256xf32>
    %19 = vector.shape_cast %18 : vector<1x2x256xf32> to vector<2x256xf32>
    %20 = vector.shape_cast %17 : vector<2x256xf32> to vector<1x2x256xf32>
    tpu.vector_store %arg8[%c2, %c0_13, %c0_14], %20 {strides = array<i32>} : memref<4x4x256xf32, #tpu.memory_space<vmem>>, vector<1x2x256xf32>,
    %21 = vector.extract_strided_slice %8 {offsets = [6, 0], sizes = [2, 256], strides = [1, 1]} : vector<8x256xf32> to vector<2x256xf32>
    %c3 = arith.constant 3 : index
    %c0_15 = arith.constant 0 : index
    %c0_16 = arith.constant 0 : index
    %22 = vector.load %arg8[%c3, %c0_15, %c0_16] : memref<4x4x256xf32, #tpu.memory_space<vmem>>, vector<1x2x256xf32>
    %23 = vector.shape_cast %22 : vector<1x2x256xf32> to vector<2x256xf32>
    %24 = vector.shape_cast %21 : vector<2x256xf32> to vector<1x2x256xf32>
    tpu.vector_store %arg8[%c3, %c0_15, %c0_16], %24 {strides = array<i32>} : memref<4x4x256xf32, #tpu.memory_space<vmem>>, vector<1x2x256xf32>,
    %c1_17 = arith.constant 1 : index
    %c0_18 = arith.constant 0 : index
    %c0_19 = arith.constant 0 : index
    %25 = vector.load %arg1[%c1_17, %c0_18, %c0_19] : memref<2x8x256xf32, #tpu.memory_space<vmem>>, vector<1x8x256xf32>
    %26 = vector.shape_cast %25 : vector<1x8x256xf32> to vector<8x256xf32>
    %cst_20 = arith.constant dense<0.000000e+00> : vector<8x256xf32>
    %27 = tpu.matmul %2, %26, %cst_20 {dimension_numbers = #tpu.dot_dimension_numbers<[1], [0], [0], [1], [0, 0, 1, 1], [], []>} : vector<8x8xf32>, vector<8x256xf32>, vector<8x256xf32> -> vector<8x256xf32>
    %28 = vector.broadcast %3 : vector<8x1xf32> to vector<8x256xf32>
    %29 = arith.addf %27, %28 : vector<8x256xf32>
    %30 = vector.extract_strided_slice %29 {offsets = [0, 0], sizes = [2, 256], strides = [1, 1]} : vector<8x256xf32> to vector<2x256xf32>
    %c0_21 = arith.constant 0 : index
    %c2_22 = arith.constant 2 : index
    %c0_23 = arith.constant 0 : index
    %31 = vector.load %arg8[%c0_21, %c2_22, %c0_23] : memref<4x4x256xf32, #tpu.memory_space<vmem>>, vector<1x2x256xf32>
    %32 = vector.shape_cast %31 : vector<1x2x256xf32> to vector<2x256xf32>
    %33 = vector.shape_cast %30 : vector<2x256xf32> to vector<1x2x256xf32>
    tpu.vector_store %arg8[%c0_21, %c2_22, %c0_23], %33 {strides = array<i32>} : memref<4x4x256xf32, #tpu.memory_space<vmem>>, vector<1x2x256xf32>,
    %34 = vector.extract_strided_slice %29 {offsets = [2, 0], sizes = [2, 256], strides = [1, 1]} : vector<8x256xf32> to vector<2x256xf32>
    %c1_24 = arith.constant 1 : index
    %c2_25 = arith.constant 2 : index
    %c0_26 = arith.constant 0 : index
    %35 = vector.load %arg8[%c1_24, %c2_25, %c0_26] : memref<4x4x256xf32, #tpu.memory_space<vmem>>, vector<1x2x256xf32>
    %36 = vector.shape_cast %35 : vector<1x2x256xf32> to vector<2x256xf32>
    %37 = vector.shape_cast %34 : vector<2x256xf32> to vector<1x2x256xf32>
    tpu.vector_store %arg8[%c1_24, %c2_25, %c0_26], %37 {strides = array<i32>} : memref<4x4x256xf32, #tpu.memory_space<vmem>>, vector<1x2x256xf32>,
    %38 = vector.extract_strided_slice %29 {offsets = [4, 0], sizes = [2, 256], strides = [1, 1]} : vector<8x256xf32> to vector<2x256xf32>
    %c2_27 = arith.constant 2 : index
    %c2_28 = arith.constant 2 : index
    %c0_29 = arith.constant 0 : index
    %39 = vector.load %arg8[%c2_27, %c2_28, %c0_29] : memref<4x4x256xf32, #tpu.memory_space<vmem>>, vector<1x2x256xf32>
    %40 = vector.shape_cast %39 : vector<1x2x256xf32> to vector<2x256xf32>
    %41 = vector.shape_cast %38 : vector<2x256xf32> to vector<1x2x256xf32>
    tpu.vector_store %arg8[%c2_27, %c2_28, %c0_29], %41 {strides = array<i32>} : memref<4x4x256xf32, #tpu.memory_space<vmem>>, vector<1x2x256xf32>,
    %42 = vector.extract_strided_slice %29 {offsets = [6, 0], sizes = [2, 256], strides = [1, 1]} : vector<8x256xf32> to vector<2x256xf32>
    %c3_30 = arith.constant 3 : index
    %c2_31 = arith.constant 2 : index
    %c0_32 = arith.constant 0 : index
    %43 = vector.load %arg8[%c3_30, %c2_31, %c0_32] : memref<4x4x256xf32, #tpu.memory_space<vmem>>, vector<1x2x256xf32>
    %44 = vector.shape_cast %43 : vector<1x2x256xf32> to vector<2x256xf32>
    %45 = vector.shape_cast %42 : vector<2x256xf32> to vector<1x2x256xf32>
    tpu.vector_store %arg8[%c3_30, %c2_31, %c0_32], %45 {strides = array<i32>} : memref<4x4x256xf32, #tpu.memory_space<vmem>>, vector<1x2x256xf32>,
    %c0_33 = arith.constant 0 : index
    %c0_34 = arith.constant 0 : index
    %c0_35 = arith.constant 0 : index
    %46 = vector.load %arg8[%c0_33, %c0_34, %c0_35] : memref<4x4x256xf32, #tpu.memory_space<vmem>>, vector<1x4x256xf32>
    %47 = vector.shape_cast %46 : vector<1x4x256xf32> to vector<4x256xf32>
    %cst_36 = arith.constant 0.000000e+00 : f32
    %cst_37 = arith.constant 6.000000e+00 : f32
    %48 = vector.broadcast %cst_36 : f32 to vector<4x256xf32>
    %49 = arith.maximumf %48, %47 : vector<4x256xf32>
    %50 = vector.broadcast %cst_37 : f32 to vector<4x256xf32>
    %51 = arith.minimumf %50, %49 : vector<4x256xf32>
    %cst_38 = arith.constant dense<0.000000e+00> : vector<4xf32>
    %52 = vector.multi_reduction <add>, %51, %cst_38 [1] : vector<4x256xf32> to vector<4xf32>
    %53 = vector.shape_cast %52 : vector<4xf32> to vector<4x1xf32>
    %cst_39 = arith.constant 2.560000e+02 : f32
    %54 = vector.broadcast %cst_39 : f32 to vector<4x1xf32>
    %55 = arith.divf %53, %54 : vector<4x1xf32>
    %56 = vector.shape_cast %55 : vector<4x1xf32> to vector<2x2x1xf32>
    %c0_40 = arith.constant 0 : index
    %c0_41 = arith.constant 0 : index
    %c0_42 = arith.constant 0 : index
    %57 = vector.load %arg1[%c0_40, %c0_41, %c0_42] : memref<2x8x256xf32, #tpu.memory_space<vmem>>, vector<2x2x256xf32>
    %58 = vector.broadcast %0 : f32 to vector<2x2x256xf32>
    %59 = arith.mulf %58, %57 : vector<2x2x256xf32>
    %60 = vector.broadcast %1 : f32 to vector<2x2x1xf32>
    %61 = arith.mulf %60, %56 : vector<2x2x1xf32>
    %62 = vector.broadcast %61 : vector<2x2x1xf32> to vector<2x2x256xf32>
    %63 = arith.addf %59, %62 : vector<2x2x256xf32>
    %c0_43 = arith.constant 0 : index
    %c0_44 = arith.constant 0 : index
    %c0_45 = arith.constant 0 : index
    %64 = vector.load %arg7[%c0_43, %c0_44, %c0_45] : memref<2x8x256xf32, #tpu.memory_space<vmem>>, vector<2x2x256xf32>
    tpu.vector_store %arg7[%c0_43, %c0_44, %c0_45], %63 {strides = array<i32>} : memref<2x8x256xf32, #tpu.memory_space<vmem>>, vector<2x2x256xf32>,
    %c1_46 = arith.constant 1 : index
    %c0_47 = arith.constant 0 : index
    %c0_48 = arith.constant 0 : index
    %65 = vector.load %arg8[%c1_46, %c0_47, %c0_48] : memref<4x4x256xf32, #tpu.memory_space<vmem>>, vector<1x4x256xf32>
    %66 = vector.shape_cast %65 : vector<1x4x256xf32> to vector<4x256xf32>
    %c0_49 = arith.constant 0 : index
    %c0_50 = arith.constant 0 : index
    %c0_51 = arith.constant 0 : index
    %67 = vector.load %arg4[%c0_49, %c0_50, %c0_51] : memref<3x256x256xf32, #tpu.memory_space<vmem>>, vector<1x256x256xf32>
    %68 = vector.shape_cast %67 : vector<1x256x256xf32> to vector<256x256xf32>
    %cst_52 = arith.constant dense<0.000000e+00> : vector<4x256xf32>
    %69 = tpu.matmul %66, %68, %cst_52 {dimension_numbers = #tpu.dot_dimension_numbers<[1], [0], [0], [1], [0, 0, 1, 1], [], []>} : vector<4x256xf32>, vector<256x256xf32>, vector<4x256xf32> -> vector<4x256xf32>
    %cst_53 = arith.constant 0.000000e+00 : f32
    %cst_54 = arith.constant 6.000000e+00 : f32
    %70 = vector.broadcast %cst_53 : f32 to vector<4x256xf32>
    %71 = arith.maximumf %70, %69 : vector<4x256xf32>
    %72 = vector.broadcast %cst_54 : f32 to vector<4x256xf32>
    %73 = arith.minimumf %72, %71 : vector<4x256xf32>
    %c0_55 = arith.constant 0 : index
    %c0_56 = arith.constant 0 : index
    %c0_57 = arith.constant 0 : index
    %74 = vector.load %arg5[%c0_55, %c0_56, %c0_57] : memref<3x256x256xf32, #tpu.memory_space<vmem>>, vector<1x256x256xf32>
    %75 = vector.shape_cast %74 : vector<1x256x256xf32> to vector<256x256xf32>
    %cst_58 = arith.constant dense<0.000000e+00> : vector<4x256xf32>
    %76 = tpu.matmul %73, %75, %cst_58 {dimension_numbers = #tpu.dot_dimension_numbers<[1], [0], [0], [1], [0, 0, 1, 1], [], []>} : vector<4x256xf32>, vector<256x256xf32>, vector<4x256xf32> -> vector<4x256xf32>
    %77 = vector.shape_cast %76 : vector<4x256xf32> to vector<2x2x256xf32>
    %c0_59 = arith.constant 0 : index
    %c2_60 = arith.constant 2 : index
    %c0_61 = arith.constant 0 : index
    %78 = vector.load %arg1[%c0_59, %c2_60, %c0_61] : memref<2x8x256xf32, #tpu.memory_space<vmem>>, vector<2x2x256xf32>
    %79 = vector.broadcast %0 : f32 to vector<2x2x256xf32>
    %80 = arith.mulf %79, %78 : vector<2x2x256xf32>
    %81 = vector.broadcast %1 : f32 to vector<2x2x256xf32>
    %82 = arith.mulf %81, %77 : vector<2x2x256xf32>
    %83 = arith.addf %80, %82 : vector<2x2x256xf32>
    %c0_62 = arith.constant 0 : index
    %c2_63 = arith.constant 2 : index
    %c0_64 = arith.constant 0 : index
    %84 = vector.load %arg7[%c0_62, %c2_63, %c0_64] : memref<2x8x256xf32, #tpu.memory_space<vmem>>, vector<2x2x256xf32>
    tpu.vector_store %arg7[%c0_62, %c2_63, %c0_64], %83 {strides = array<i32>} : memref<2x8x256xf32, #tpu.memory_space<vmem>>, vector<2x2x256xf32>,
    %c2_65 = arith.constant 2 : index
    %c0_66 = arith.constant 0 : index
    %c0_67 = arith.constant 0 : index
    %85 = vector.load %arg8[%c2_65, %c0_66, %c0_67] : memref<4x4x256xf32, #tpu.memory_space<vmem>>, vector<1x4x256xf32>
    %86 = vector.shape_cast %85 : vector<1x4x256xf32> to vector<4x256xf32>
    %c1_68 = arith.constant 1 : index
    %c0_69 = arith.constant 0 : index
    %c0_70 = arith.constant 0 : index
    %87 = vector.load %arg4[%c1_68, %c0_69, %c0_70] : memref<3x256x256xf32, #tpu.memory_space<vmem>>, vector<1x256x256xf32>
    %88 = vector.shape_cast %87 : vector<1x256x256xf32> to vector<256x256xf32>
    %cst_71 = arith.constant dense<0.000000e+00> : vector<4x256xf32>
    %89 = tpu.matmul %86, %88, %cst_71 {dimension_numbers = #tpu.dot_dimension_numbers<[1], [0], [0], [1], [0, 0, 1, 1], [], []>} : vector<4x256xf32>, vector<256x256xf32>, vector<4x256xf32> -> vector<4x256xf32>
    %cst_72 = arith.constant 0.000000e+00 : f32
    %cst_73 = arith.constant 6.000000e+00 : f32
    %90 = vector.broadcast %cst_72 : f32 to vector<4x256xf32>
    %91 = arith.maximumf %90, %89 : vector<4x256xf32>
    %92 = vector.broadcast %cst_73 : f32 to vector<4x256xf32>
    %93 = arith.minimumf %92, %91 : vector<4x256xf32>
    %c1_74 = arith.constant 1 : index
    %c0_75 = arith.constant 0 : index
    %c0_76 = arith.constant 0 : index
    %94 = vector.load %arg5[%c1_74, %c0_75, %c0_76] : memref<3x256x256xf32, #tpu.memory_space<vmem>>, vector<1x256x256xf32>
    %95 = vector.shape_cast %94 : vector<1x256x256xf32> to vector<256x256xf32>
    %cst_77 = arith.constant dense<0.000000e+00> : vector<4x256xf32>
    %96 = tpu.matmul %93, %95, %cst_77 {dimension_numbers = #tpu.dot_dimension_numbers<[1], [0], [0], [1], [0, 0, 1, 1], [], []>} : vector<4x256xf32>, vector<256x256xf32>, vector<4x256xf32> -> vector<4x256xf32>
    %97 = vector.shape_cast %96 : vector<4x256xf32> to vector<2x2x256xf32>
    %c0_78 = arith.constant 0 : index
    %c4 = arith.constant 4 : index
    %c0_79 = arith.constant 0 : index
    %98 = vector.load %arg1[%c0_78, %c4, %c0_79] : memref<2x8x256xf32, #tpu.memory_space<vmem>>, vector<2x2x256xf32>
    %99 = vector.broadcast %0 : f32 to vector<2x2x256xf32>
    %100 = arith.mulf %99, %98 : vector<2x2x256xf32>
    %101 = vector.broadcast %1 : f32 to vector<2x2x256xf32>
    %102 = arith.mulf %101, %97 : vector<2x2x256xf32>
    %103 = arith.addf %100, %102 : vector<2x2x256xf32>
    %c0_80 = arith.constant 0 : index
    %c4_81 = arith.constant 4 : index
    %c0_82 = arith.constant 0 : index
    %104 = vector.load %arg7[%c0_80, %c4_81, %c0_82] : memref<2x8x256xf32, #tpu.memory_space<vmem>>, vector<2x2x256xf32>
    tpu.vector_store %arg7[%c0_80, %c4_81, %c0_82], %103 {strides = array<i32>} : memref<2x8x256xf32, #tpu.memory_space<vmem>>, vector<2x2x256xf32>,
    %c3_83 = arith.constant 3 : index
    %c0_84 = arith.constant 0 : index
    %c0_85 = arith.constant 0 : index
    %105 = vector.load %arg8[%c3_83, %c0_84, %c0_85] : memref<4x4x256xf32, #tpu.memory_space<vmem>>, vector<1x4x256xf32>
    %106 = vector.shape_cast %105 : vector<1x4x256xf32> to vector<4x256xf32>
    %c2_86 = arith.constant 2 : index
    %c0_87 = arith.constant 0 : index
    %c0_88 = arith.constant 0 : index
    %107 = vector.load %arg4[%c2_86, %c0_87, %c0_88] : memref<3x256x256xf32, #tpu.memory_space<vmem>>, vector<1x256x256xf32>
    %108 = vector.shape_cast %107 : vector<1x256x256xf32> to vector<256x256xf32>
    %cst_89 = arith.constant dense<0.000000e+00> : vector<4x256xf32>
    %109 = tpu.matmul %106, %108, %cst_89 {dimension_numbers = #tpu.dot_dimension_numbers<[1], [0], [0], [1], [0, 0, 1, 1], [], []>} : vector<4x256xf32>, vector<256x256xf32>, vector<4x256xf32> -> vector<4x256xf32>
    %cst_90 = arith.constant 0.000000e+00 : f32
    %cst_91 = arith.constant 6.000000e+00 : f32
    %110 = vector.broadcast %cst_90 : f32 to vector<4x256xf32>
    %111 = arith.maximumf %110, %109 : vector<4x256xf32>
    %112 = vector.broadcast %cst_91 : f32 to vector<4x256xf32>
    %113 = arith.minimumf %112, %111 : vector<4x256xf32>
    %c2_92 = arith.constant 2 : index
    %c0_93 = arith.constant 0 : index
    %c0_94 = arith.constant 0 : index
    %114 = vector.load %arg5[%c2_92, %c0_93, %c0_94] : memref<3x256x256xf32, #tpu.memory_space<vmem>>, vector<1x256x256xf32>
    %115 = vector.shape_cast %114 : vector<1x256x256xf32> to vector<256x256xf32>
    %cst_95 = arith.constant dense<0.000000e+00> : vector<4x256xf32>
    %116 = tpu.matmul %113, %115, %cst_95 {dimension_numbers = #tpu.dot_dimension_numbers<[1], [0], [0], [1], [0, 0, 1, 1], [], []>} : vector<4x256xf32>, vector<256x256xf32>, vector<4x256xf32> -> vector<4x256xf32>
    %117 = vector.shape_cast %116 : vector<4x256xf32> to vector<2x2x256xf32>
    %c0_96 = arith.constant 0 : index
    %c6 = arith.constant 6 : index
    %c0_97 = arith.constant 0 : index
    %118 = vector.load %arg1[%c0_96, %c6, %c0_97] : memref<2x8x256xf32, #tpu.memory_space<vmem>>, vector<2x2x256xf32>
    %119 = vector.broadcast %0 : f32 to vector<2x2x256xf32>
    %120 = arith.mulf %119, %118 : vector<2x2x256xf32>
    %121 = vector.broadcast %1 : f32 to vector<2x2x256xf32>
    %122 = arith.mulf %121, %117 : vector<2x2x256xf32>
    %123 = arith.addf %120, %122 : vector<2x2x256xf32>
    %c0_98 = arith.constant 0 : index
    %c6_99 = arith.constant 6 : index
    %c0_100 = arith.constant 0 : index
    %124 = vector.load %arg7[%c0_98, %c6_99, %c0_100] : memref<2x8x256xf32, #tpu.memory_space<vmem>>, vector<2x2x256xf32>
    tpu.vector_store %arg7[%c0_98, %c6_99, %c0_100], %123 {strides = array<i32>} : memref<2x8x256xf32, #tpu.memory_space<vmem>>, vector<2x2x256xf32>,
    return
  }
  func.func @transform_0(%arg0: i32) -> (i32, i32, i32) {
    %c0_i32 = arith.constant 0 : i32
    %c0_i32_0 = arith.constant 0 : i32
    %c0_i32_1 = arith.constant 0 : i32
    return %arg0, %c0_i32, %c0_i32_0 : i32, i32, i32
  }
  func.func @transform_1(%arg0: i32) -> (i32, i32) {
    %c0_i32 = arith.constant 0 : i32
    %c0_i32_0 = arith.constant 0 : i32
    %c0_i32_1 = arith.constant 0 : i32
    return %c0_i32, %c0_i32_0 : i32, i32
  }
  func.func @transform_2(%arg0: i32) -> (i32, i32) {
    %c0_i32 = arith.constant 0 : i32
    %c0_i32_0 = arith.constant 0 : i32
    %c0_i32_1 = arith.constant 0 : i32
    return %c0_i32, %c0_i32_0 : i32, i32
  }
  func.func @transform_3(%arg0: i32) -> (i32, i32, i32) {
    %c0_i32 = arith.constant 0 : i32
    %c0_i32_0 = arith.constant 0 : i32
    %c0_i32_1 = arith.constant 0 : i32
    %c0_i32_2 = arith.constant 0 : i32
    return %c0_i32, %c0_i32_0, %c0_i32_1 : i32, i32, i32
  }
  func.func @transform_4(%arg0: i32) -> (i32, i32, i32) {
    %c0_i32 = arith.constant 0 : i32
    %c0_i32_0 = arith.constant 0 : i32
    %c0_i32_1 = arith.constant 0 : i32
    %c0_i32_2 = arith.constant 0 : i32
    return %c0_i32, %c0_i32_0, %c0_i32_1 : i32, i32, i32
  }
  func.func @transform_5(%arg0: i32) -> i32 {
    %c0_i32 = arith.constant 0 : i32
    %c0_i32_0 = arith.constant 0 : i32
    return %c0_i32 : i32
  }
  func.func @transform_6(%arg0: i32) -> (i32, i32, i32) {
    %c0_i32 = arith.constant 0 : i32
    %c0_i32_0 = arith.constant 0 : i32
    %c0_i32_1 = arith.constant 0 : i32
    return %arg0, %c0_i32, %c0_i32_0 : i32, i32, i32
  }
}

</mosaic_0001>

<bundles_post_ra>
// kernel: tpu_custom_call.1
= control target key start
LH: loop header
LB: loop body
LE: loop exit
PB: predicated region body
PF: predicated region fallthrough
CT: control target
= control target key end

     0   :  { %11 = vsyncpa [#allocation4], 0  ;;  %s1616_s0 = inlined_call_operand.hbm [shape: f32[2,8,256], index: 0, kind: input, shape index: {}]   ;;  %s1617_s1 = inlined_call_operand.vmem [shape: f32[8,8], index: 1, kind: input, shape index: {}]   ;;  %s1618_s2 = inlined_call_operand.vmem [shape: f32[8,1], index: 2, kind: input, shape index: {}]   ;;  %s1619_s3 = inlined_call_operand.hbm [shape: f32[3,256,256], index: 3, kind: input, shape index: {}]   ;;  %s1620_s4 = inlined_call_operand.hbm [shape: f32[3,256,256], index: 4, kind: input, shape index: {}]   ;;  %s1621_s5 = inlined_call_operand.vmem [shape: f32[2], index: 5, kind: input, shape index: {}]   ;;  %s1622_s6 = inlined_call_operand.hbm [shape: f32[2,8,256], index: 6, kind: output, shape index: {}]  }
   0x1   :  { %12 = vsyncpa [#allocation8], 0 }
   0x2   :  { %13 = vsyncpa [#allocation6], 0 }
   0x3   :  { %14 = vsyncpa [#allocation5], 0  ;;  %s1485_s21 = smov [#allocation7]   ;;  %s1486_s23 = smov [#allocation3]  }
   0x4   :  { %s36_s22 = sshll.u32 %s1485_s21, 4  ;;  %s20_s24 = sshll.u32 %s1486_s23, 4  ;;  %s37_s22 = int_to_ptr.vmem [resolvable:$true] %s36_s22  ;;  %s21_s24 = int_to_ptr.vmem [resolvable:$true] %s20_s24 }
   0x5   :  { %s1393_s25 = scalar_lea.vmem %s37_s22, 24576  ;;  %p1398_p1 = scmp.lt.s32.totalorder %s37_s22, %s37_s22 }
   0x6   :  { %p1394_p0 = scmp.ne.s32.totalorder %s37_s22, %s1393_s25  ;;  %p1399_p2 = scmp.lt.s32.totalorder %s1393_s25, %s1393_s25 }
   0x8   :  { %p1400_p3 = por %p1399_p2, %p1398_p1 }
   0xa   :  { %p1401_p4 = pnand %p1400_p3, %p1394_p0 }
   0xc   :  { %1404 = shalt.err (!%p1401_p4)
}
   0xd   :  { %s1487_s26 = smov 256   ;;  %s1488_s27 = smov 16  }
   0xe   :  { %42 = dma.hbm_to_vmem [thread:$0]  %s1619_s3, 24576, %s37_s22, [#allocation8], %s1487_s26, %s1487_s26, %s1488_s27  }
   0xf   :  { %s1413_s30 = scalar_lea.vmem %s21_s24, 512  ;;  %p1418_p6 = scmp.lt.s32.totalorder %s21_s24, %s21_s24 }
  0x10   :  { %p1414_p5 = scmp.ne.s32.totalorder %s21_s24, %s1413_s30  ;;  %p1419_p7 = scmp.lt.s32.totalorder %s1413_s30, %s1413_s30 }
  0x12   :  { %p1420_p8 = por %p1419_p7, %p1418_p6 }
  0x14   :  { %p1421_p9 = pnand %p1420_p8, %p1414_p5 }
  0x16   :  { %1424 = shalt.err (!%p1421_p9)
}
  0x17   :  { %26 = dma.hbm_to_vmem [thread:$0]  %s1616_s0, 512, %s21_s24, [#allocation4], %s1487_s26, %s1487_s26, %s1488_s27  }
  0x18   :  { %s61_s11 = sshll.u32 %s1621_s5, 4  ;;  %s1489_s12 = smov [#allocation9]   ;;  %s62_s11 = int_to_ptr.vmem [resolvable:$true] %s61_s11 }
  0x19   :  { %s48_s3 = sshll.u32 %s1489_s12, 4  ;;  %s49_s3 = int_to_ptr.vmem [resolvable:$true] %s48_s3 }
  0x1a   :  { %s1433_s13 = scalar_lea.vmem %s49_s3, 24576  ;;  %p1438_p11 = scmp.lt.s32.totalorder %s49_s3, %s49_s3 }
  0x1b   :  { %p1434_p10 = scmp.ne.s32.totalorder %s49_s3, %s1433_s13  ;;  %p1439_p12 = scmp.lt.s32.totalorder %s1433_s13, %s1433_s13 }
  0x1d   :  { %p1440_p13 = por %p1439_p12, %p1438_p11 }
  0x1f   :  { %p1441_p0 = pnand %p1440_p13, %p1434_p10 }
  0x21   :  { %1444 = shalt.err (!%p1441_p0)
}
  0x22   :  { %54 = dma.hbm_to_vmem [thread:$0]  %s1620_s4, 24576, %s49_s3, [#allocation8], %s1487_s26, %s1487_s26, %s1488_s27  }
  0x23   :  { %s1445_s15 = scalar_lea.vmem %s62_s11, 16  ;;  %p1450_p2 = scmp.lt.s32.totalorder %s62_s11, %s62_s11 }
  0x24   :  { %p1446_p1 = scmp.ne.s32.totalorder %s62_s11, %s1445_s15  ;;  %p1451_p3 = scmp.lt.s32.totalorder %s1445_s15, %s1445_s15 }
  0x26   :  { %p1452_p4 = por %p1451_p3, %p1450_p2 }
  0x28   :  { %p1453_p5 = pnand %p1452_p4, %p1446_p1 }
  0x2a   :  { %1456 = shalt.err (!%p1453_p5)
}
  0x2b   :  { %s1490_s5 = smov [#allocation10]  }
  0x2c   :  { %64 = dma.vmem_to_smem %s62_s11, 16, %s1490_s5, [#allocation6]  }
  0x2d   :  { %1477 = dma.done.wait [#allocation4], 512  }
  0x2e   :  { %1478 = vsyncadd [#allocation4], 4294966784 }
  0x2f   :  { %1479 = dma.done.wait [#allocation8], 49152  }
  0x30   :  { %1480 = vsyncadd [#allocation8], 4294918144 }
  0x31   :  { %1481 = dma.done.wait [#allocation6], 16  }
  0x32   :  { %1482 = vsyncadd [#allocation6], 4294967280 }
  0x33   :  { %77 = sfence }
  0x34   :  { %v83_v0 = vld [vmem:[#allocation3 + $0x8] sm:$0xff]  ;;  %v185_v1 = vld [vmem:[#allocation3 + $0x18] sm:$0xff]  ;;  %v82_v2 = vld [vmem:[#allocation3] sm:$0xff]  ;;  %vm89_vm0 = vcmask 64512   ;;  %v1491_v5 = vmov 0.0   ;;  %v1492_v10 = vmov 0  }
  0x35   :  { %123 = vmatprep.subr.mxu0 %v83_v0  ;;  %216 = vmatprep.subr.mxu1 %v185_v1  ;;  %v184_v3 = vld [vmem:[#allocation3 + $0x10] sm:$0xff]  ;;  %v80_v4 = vld [vmem:[%s1617_s1] sm:$0xff]  ;;  %v376_v6 = vld [vmem:[#allocation7 + $0xf8] sm:$0xff]  ;;  %vm277_vm1 = vcmask 1043456   ;;  %s1364_s1 = sld [smem:[#allocation10 + $0x1]]  ;;  %s1496_s19 = smov [#allocation11]  }
  0x36   :  { %124 = vmatpush1.msra.mxu0 %v82_v2  ;;  %157 = vmatprep.mubr.f32.mxu0 %v1491_v5  ;;  %v81_v7 = vld [vmem:[%s1618_s2] sm:$0xff]  ;;  %v375_v8 = vld [vmem:[#allocation7 + $0xf0] sm:$0xff]  ;;  %v374_v9 = vld [vmem:[#allocation7 + $0xe8] sm:$0xff]  ;;  %s78_s2 = sld [smem:[#allocation10]]  ;;  %s1350_s20 = sshll.u32 %s1496_s19, 4  ;;  %s1351_s20 = int_to_ptr.vmem [resolvable:$true] %s1350_s20 }
  0x37   :  { %217 = vmatpush1.msra.mxu1 %v184_v3  ;;  %250 = vmatprep.mubr.f32.mxu1 %v1491_v5  ;;  %v373_v11 = vld [vmem:[#allocation7 + $0xe0] sm:$0xff]  ;;  %v372_v12 = vld [vmem:[#allocation7 + $0xd8] sm:$0xff]  ;;  %v371_v13 = vld [vmem:[#allocation7 + $0xd0] sm:$0xff]  ;;  %s1457_s21 = scalar_lea.vmem %s1351_s20, 512  ;;  %p1462_p7 = scmp.lt.s32.totalorder %s1351_s20, %s1351_s20 }
  0x38   :  { %1365 = vmatmul.mubr.msk.f32.vlgmr.msra.gmra.mxu0 %vm89_vm0, %v80_v4  ;;  %1368 = vmatmul.mubr.msk.f32.vlgmr.msra.gmra.mxu1 %vm89_vm0, %v80_v4  ;;  %v370_v14 = vld [vmem:[#allocation7 + $0xc8] sm:$0xff]  ;;  %v369_v15 = vld [vmem:[#allocation7 + $0xc0] sm:$0xff]  ;;  %v368_v16 = vld [vmem:[#allocation7 + $0xb8] sm:$0xff]  ;;  %p1458_p6 = scmp.ne.s32.totalorder %s1351_s20, %s1457_s21  ;;  %p1463_p8 = scmp.lt.s32.totalorder %s1457_s21, %s1457_s21 }
  0x39   :  { %1381 = vset.pattern.permute.xlu0 %v1492_v10  ;;  %412 = vmatprep.subr.mxu0 %v376_v6  ;;  %v367_v17 = vld [vmem:[#allocation7 + $0xb0] sm:$0xff]  ;;  %v366_v18 = vld [vmem:[#allocation7 + $0xa8] sm:$0xff]  ;;  %v365_v19 = vld [vmem:[#allocation7 + $0xa0] sm:$0xff] }
  0x3a   :  { %86 = vperm.xlu0 %1381, %v81_v7   ;;  %413 = vmatpush1.msra.mxu0 %v375_v8  ;;  %v364_v20 = vld [vmem:[#allocation7 + $0x98] sm:$0xff]  ;;  %v363_v21 = vld [vmem:[#allocation7 + $0x90] sm:$0xff]  ;;  %v362_v22 = vld [vmem:[#allocation7 + $0x88] sm:$0xff]  ;;  %p1464_p9 = por %p1463_p8, %p1462_p7 }
  0x3b   :  { %414 = vmatprep.subr.mxu0 %v374_v9  ;;  %v361_v23 = vld [vmem:[#allocation7 + $0x80] sm:$0xff]  ;;  %v360_v24 = vld [vmem:[#allocation7 + $0x78] sm:$0xff]  ;;  %v359_v25 = vld [vmem:[#allocation7 + $0x70] sm:$0xff] }
  0x3c   :  { %415 = vmatpush1.msra.mxu0 %v373_v11  ;;  %v358_v26 = vld [vmem:[#allocation7 + $0x68] sm:$0xff]  ;;  %v357_v27 = vld [vmem:[#allocation7 + $0x60] sm:$0xff]  ;;  %v356_v28 = vld [vmem:[#allocation7 + $0x58] sm:$0xff]  ;;  %p1465_p10 = pnand %p1464_p9, %p1458_p6 }
  0x3d   :  { %416 = vmatprep.subr.mxu0 %v372_v12  ;;  %v355_v29 = vld [vmem:[#allocation7 + $0x50] sm:$0xff]  ;;  %v354_v30 = vld [vmem:[#allocation7 + $0x48] sm:$0xff]  ;;  %v353_v31 = vld [vmem:[#allocation7 + $0x40] sm:$0xff] }
  0x3e   :  { %417 = vmatpush1.msra.mxu0 %v371_v13  ;;  %v352_v32 = vld [vmem:[#allocation7 + $0x38] sm:$0xff]  ;;  %v351_v33 = vld [vmem:[#allocation7 + $0x30] sm:$0xff]  ;;  %v350_v34 = vld [vmem:[#allocation7 + $0x28] sm:$0xff] }
  0x3f   :  { %418 = vmatprep.subr.mxu0 %v370_v14  ;;  %v349_v35 = vld [vmem:[#allocation7 + $0x20] sm:$0xff]  ;;  %v348_v36 = vld [vmem:[#allocation7 + $0x18] sm:$0xff]  ;;  %v347_v37 = vld [vmem:[#allocation7 + $0x10] sm:$0xff] }
  0x40   :  { %419 = vmatpush1.msra.mxu0 %v369_v15  ;;  %v346_v38 = vld [vmem:[#allocation7 + $0x8] sm:$0xff]  ;;  %v345_v39 = vld [vmem:[#allocation7] sm:$0xff]  ;;  %v408_v40 = vld [vmem:[#allocation7 + $0x1f8] sm:$0xff] }
  0x41   :  { %420 = vmatprep.subr.mxu0 %v368_v16  ;;  %v407_v41 = vld [vmem:[#allocation7 + $0x1f0] sm:$0xff]  ;;  %v406_v42 = vld [vmem:[#allocation7 + $0x1e8] sm:$0xff]  ;;  %v405_v43 = vld [vmem:[#allocation7 + $0x1e0] sm:$0xff] }
  0x42   :  { %421 = vmatpush1.msra.mxu0 %v367_v17  ;;  %v404_v44 = vld [vmem:[#allocation7 + $0x1d8] sm:$0xff]  ;;  %v403_v45 = vld [vmem:[#allocation7 + $0x1d0] sm:$0xff]  ;;  %v402_v46 = vld [vmem:[#allocation7 + $0x1c8] sm:$0xff] }
  0x43   :  { %422 = vmatprep.subr.mxu0 %v366_v18  ;;  %v401_v47 = vld [vmem:[#allocation7 + $0x1c0] sm:$0xff]  ;;  %v400_v48 = vld [vmem:[#allocation7 + $0x1b8] sm:$0xff]  ;;  %v399_v49 = vld [vmem:[#allocation7 + $0x1b0] sm:$0xff] }
  0x44   :  { %423 = vmatpush1.msra.mxu0 %v365_v19  ;;  %v398_v50 = vld [vmem:[#allocation7 + $0x1a8] sm:$0xff]  ;;  %v397_v51 = vld [vmem:[#allocation7 + $0x1a0] sm:$0xff]  ;;  %v396_v52 = vld [vmem:[#allocation7 + $0x198] sm:$0xff] }
  0x45   :  { %424 = vmatprep.subr.mxu0 %v364_v20  ;;  %v395_v53 = vld [vmem:[#allocation7 + $0x190] sm:$0xff]  ;;  %v394_v54 = vld [vmem:[#allocation7 + $0x188] sm:$0xff]  ;;  %v393_v55 = vld [vmem:[#allocation7 + $0x180] sm:$0xff] }
  0x46   :  { %425 = vmatpush1.msra.mxu0 %v363_v21  ;;  %v392_v56 = vld [vmem:[#allocation7 + $0x178] sm:$0xff]  ;;  %v391_v57 = vld [vmem:[#allocation7 + $0x170] sm:$0xff]  ;;  %v390_v58 = vld [vmem:[#allocation7 + $0x168] sm:$0xff] }
  0x47   :  { %426 = vmatprep.subr.mxu0 %v362_v22  ;;  %v389_v59 = vld [vmem:[#allocation7 + $0x160] sm:$0xff]  ;;  %v388_v60 = vld [vmem:[#allocation7 + $0x158] sm:$0xff]  ;;  %v387_v61 = vld [vmem:[#allocation7 + $0x150] sm:$0xff] }
  0x48   :  { %427 = vmatpush1.msra.mxu0 %v361_v23  ;;  %v386_v62 = vld [vmem:[#allocation7 + $0x148] sm:$0xff]  ;;  %v385_v63 = vld [vmem:[#allocation7 + $0x140] sm:$0xff]  ;;  %v384_v0 = vld [vmem:[#allocation7 + $0x138] sm:$0xff] }
  0x49   :  { %428 = vmatprep.subr.mxu0 %v360_v24  ;;  %v383_v1 = vld [vmem:[#allocation7 + $0x130] sm:$0xff]  ;;  %v382_v2 = vld [vmem:[#allocation7 + $0x128] sm:$0xff]  ;;  %v381_v3 = vld [vmem:[#allocation7 + $0x120] sm:$0xff] }
  0x4a   :  { %429 = vmatpush1.msra.mxu0 %v359_v25  ;;  %v380_v4 = vld [vmem:[#allocation7 + $0x118] sm:$0xff]  ;;  %v379_v5 = vld [vmem:[#allocation7 + $0x110] sm:$0xff]  ;;  %v378_v6 = vld [vmem:[#allocation7 + $0x108] sm:$0xff] }
  0x4b   :  { %430 = vmatprep.subr.mxu0 %v358_v26  ;;  %v377_v7 = vld [vmem:[#allocation7 + $0x100] sm:$0xff]  ;;  %v710_v8 = vld [vmem:[#allocation7 + $0x2f8] sm:$0xff] }
  0x4c   :  { %431 = vmatpush1.msra.mxu0 %v357_v27 }
  0x4d   :  { %432 = vmatprep.subr.mxu0 %v356_v28 }
  0x4e   :  { %433 = vmatpush1.msra.mxu0 %v355_v29 }
  0x4f   :  { %434 = vmatprep.subr.mxu0 %v354_v30 }
  0x50   :  { %435 = vmatpush1.msra.mxu0 %v353_v31  ;;  %v709_v31 = vld [vmem:[#allocation7 + $0x2f0] sm:$0xff] }
  0x51   :  { %436 = vmatprep.subr.mxu0 %v352_v32  ;;  %v708_v32 = vld [vmem:[#allocation7 + $0x2e8] sm:$0xff] }
  0x52   :  { %437 = vmatpush1.msra.mxu0 %v351_v33 }
  0x53   :  { %438 = vmatprep.subr.mxu0 %v350_v34 }
  0x54   :  { %439 = vmatpush1.msra.mxu0 %v349_v35  ;;  %v707_v35 = vld [vmem:[#allocation7 + $0x2e0] sm:$0xff] }
  0x55   :  { %440 = vmatprep.subr.mxu0 %v348_v36  ;;  %v518_v36 = vld [vmem:[#allocation9 + $0xf8] sm:$0xff] }
  0x56   :  { %441 = vmatpush1.msra.mxu0 %v347_v37  ;;  %v517_v37 = vld [vmem:[#allocation9 + $0xf0] sm:$0xff]  ;;  %551 = vmatprep.subr.mxu1 %v518_v36  ;;  %v738_v36 = vld [vmem:[#allocation7 + $0x3d8] sm:$0xff] }
  0x57   :  { %442 = vmatprep.subr.mxu0 %v346_v38  ;;  %v706_v38 = vld [vmem:[#allocation7 + $0x2d8] sm:$0xff]  ;;  %552 = vmatpush1.msra.mxu1 %v517_v37  ;;  %v491_v37 = vld [vmem:[#allocation9 + $0x20] sm:$0xff] }
  0x58   :  { %443 = vmatpush1.msra.mxu0 %v345_v39 }
  0x59   :  { %444 = vmatprep.subr.mxu0 %v408_v40  ;;  %v516_v40 = vld [vmem:[#allocation9 + $0xe8] sm:$0xff] }
  0x5a   :  { %445 = vmatpush2.msra.mxu0 %v407_v41  ;;  %v705_v41 = vld [vmem:[#allocation7 + $0x2d0] sm:$0xff]  ;;  %553 = vmatprep.subr.mxu1 %v516_v40  ;;  %v736_v40 = vld [vmem:[#allocation7 + $0x3c8] sm:$0xff] }
  0x5b   :  { %446 = vmatprep.subr.mxu0 %v406_v42  ;;  %v515_v42 = vld [vmem:[#allocation9 + $0xe0] sm:$0xff] }
  0x5c   :  { %447 = vmatpush2.msra.mxu0 %v405_v43  ;;  %v704_v43 = vld [vmem:[#allocation7 + $0x2c8] sm:$0xff]  ;;  %554 = vmatpush1.msra.mxu1 %v515_v42  ;;  %v735_v42 = vld [vmem:[#allocation7 + $0x3c0] sm:$0xff] }
  0x5d   :  { %448 = vmatprep.subr.mxu0 %v404_v44 }
  0x5e   :  { %449 = vmatpush2.msra.mxu0 %v403_v45 }
  0x5f   :  { %450 = vmatprep.subr.mxu0 %v402_v46  ;;  %v703_v46 = vld [vmem:[#allocation7 + $0x2c0] sm:$0xff] }
  0x60   :  { %451 = vmatpush2.msra.mxu0 %v401_v47 }
  0x61   :  { %452 = vmatprep.subr.mxu0 %v400_v48  ;;  %v514_v48 = vld [vmem:[#allocation9 + $0xd8] sm:$0xff] }
  0x62   :  { %453 = vmatpush2.msra.mxu0 %v399_v49  ;;  %v702_v49 = vld [vmem:[#allocation7 + $0x2b8] sm:$0xff]  ;;  %555 = vmatprep.subr.mxu1 %v514_v48  ;;  %v732_v48 = vld [vmem:[#allocation7 + $0x3a8] sm:$0xff] }
  0x63   :  { %454 = vmatprep.subr.mxu0 %v398_v50  ;;  %v513_v50 = vld [vmem:[#allocation9 + $0xd0] sm:$0xff] }
  0x64   :  { %455 = vmatpush2.msra.mxu0 %v397_v51  ;;  %v701_v51 = vld [vmem:[#allocation7 + $0x2b0] sm:$0xff]  ;;  %556 = vmatpush1.msra.mxu1 %v513_v50  ;;  %v731_v50 = vld [vmem:[#allocation7 + $0x3a0] sm:$0xff] }
  0x65   :  { %456 = vmatprep.subr.mxu0 %v396_v52  ;;  %v512_v52 = vld [vmem:[#allocation9 + $0xc8] sm:$0xff] }
  0x66   :  { %457 = vmatpush2.msra.mxu0 %v395_v53  ;;  %v700_v53 = vld [vmem:[#allocation7 + $0x2a8] sm:$0xff]  ;;  %557 = vmatprep.subr.mxu1 %v512_v52  ;;  %v730_v52 = vld [vmem:[#allocation7 + $0x398] sm:$0xff] }
  0x67   :  { %458 = vmatprep.subr.mxu0 %v394_v54  ;;  %v511_v54 = vld [vmem:[#allocation9 + $0xc0] sm:$0xff] }
  0x68   :  { %459 = vmatpush2.msra.mxu0 %v393_v55  ;;  %v699_v55 = vld [vmem:[#allocation7 + $0x2a0] sm:$0xff]  ;;  %558 = vmatpush1.msra.mxu1 %v511_v54  ;;  %v729_v54 = vld [vmem:[#allocation7 + $0x390] sm:$0xff] }
  0x69   :  { %460 = vmatprep.subr.mxu0 %v392_v56  ;;  %v510_v56 = vld [vmem:[#allocation9 + $0xb8] sm:$0xff] }
  0x6a   :  { %461 = vmatpush2.msra.mxu0 %v391_v57  ;;  %v698_v57 = vld [vmem:[#allocation7 + $0x298] sm:$0xff]  ;;  %559 = vmatprep.subr.mxu1 %v510_v56  ;;  %v728_v56 = vld [vmem:[#allocation7 + $0x388] sm:$0xff] }
  0x6b   :  { %462 = vmatprep.subr.mxu0 %v390_v58  ;;  %v697_v58 = vld [vmem:[#allocation7 + $0x290] sm:$0xff] }
  0x6c   :  { %463 = vmatpush2.msra.mxu0 %v389_v59  ;;  %v696_v59 = vld [vmem:[#allocation7 + $0x288] sm:$0xff] }
  0x6d   :  { %464 = vmatprep.subr.mxu0 %v388_v60  ;;  %v695_v60 = vld [vmem:[#allocation7 + $0x280] sm:$0xff] }
  0x6e   :  { %465 = vmatpush2.msra.mxu0 %v387_v61  ;;  %v694_v61 = vld [vmem:[#allocation7 + $0x278] sm:$0xff] }
  0x6f   :  { %466 = vmatprep.subr.mxu0 %v386_v62  ;;  %v693_v62 = vld [vmem:[#allocation7 + $0x270] sm:$0xff] }
  0x70   :  { %467 = vmatpush2.msra.mxu0 %v385_v63  ;;  %v692_v63 = vld [vmem:[#allocation7 + $0x268] sm:$0xff] }
  0x71   :  { %468 = vmatprep.subr.mxu0 %v384_v0  ;;  %v691_v0 = vld [vmem:[#allocation7 + $0x260] sm:$0xff] }
  0x72   :  { %469 = vmatpush2.msra.mxu0 %v383_v1  ;;  %v509_v1 = vld [vmem:[#allocation9 + $0xb0] sm:$0xff] }
  0x73   :  { %470 = vmatprep.subr.mxu0 %v382_v2  ;;  %v690_v2 = vld [vmem:[#allocation7 + $0x258] sm:$0xff]  ;;  %560 = vmatpush1.msra.mxu1 %v509_v1  ;;  %v541_v1 = vld [vmem:[#allocation9 + $0x1b0] sm:$0xff] }
  0x74   :  { %471 = vmatpush2.msra.mxu0 %v381_v3  ;;  %v508_v3 = vld [vmem:[#allocation9 + $0xa8] sm:$0xff] }
  0x75   :  { %472 = vmatprep.subr.mxu0 %v380_v4  ;;  %v689_v4 = vld [vmem:[#allocation7 + $0x250] sm:$0xff]  ;;  %561 = vmatprep.subr.mxu1 %v508_v3  ;;  %v540_v3 = vld [vmem:[#allocation9 + $0x1a8] sm:$0xff] }
  0x76   :  { %473 = vmatpush2.msra.mxu0 %v379_v5  ;;  %v507_v5 = vld [vmem:[#allocation9 + $0xa0] sm:$0xff] }
  0x77   :  { %474 = vmatprep.subr.mxu0 %v378_v6  ;;  %v688_v6 = vld [vmem:[#allocation7 + $0x248] sm:$0xff]  ;;  %562 = vmatpush1.msra.mxu1 %v507_v5  ;;  %v539_v5 = vld [vmem:[#allocation9 + $0x1a0] sm:$0xff] }
  0x78   :  { %475 = vmatpush2.msra.mxu0 %v377_v7  ;;  %v506_v7 = vld [vmem:[#allocation9 + $0x98] sm:$0xff] }
  0x79   :  { %746 = vmatprep.subr.mxu0 %v710_v8  ;;  %v687_v8 = vld [vmem:[#allocation7 + $0x240] sm:$0xff]  ;;  %563 = vmatprep.subr.mxu1 %v506_v7  ;;  %v538_v7 = vld [vmem:[#allocation9 + $0x198] sm:$0xff] }
  0xb5   :  { %v87_v9 = vpop.permute.xlu0 %86 }
  0xf8   :  { %v159_v10 = vpop.f32.mrf.mxu0  ;;  %v252_v11 = vpop.f32.mrf.mxu1 }
  0xf9   :  { %v253_v12 = vadd.f32 %v252_v11, %v87_v9  ;;  %v160_v15 = vadd.f32 %v159_v10, %v87_v9  ;;  %v686_v10 = vld [vmem:[#allocation7 + $0x238] sm:$0xff]  ;;  %v504_v11 = vld [vmem:[#allocation9 + $0x88] sm:$0xff] }
  0xfa   :  { %v161_v13 = vpop.f32.mrf.mxu0  ;;  %v254_v14 = vpop.f32.mrf.mxu1 }
  0xfb   :  { %v162_v16 = vadd.f32 %v161_v13, %v87_v9  ;;  %v255_v17 = vadd.f32 %v254_v14, %v87_v9  ;;  %v505_v9 = vld [vmem:[#allocation9 + $0x90] sm:$0xff]  ;;  %v503_v13 = vld [vmem:[#allocation9 + $0x80] sm:$0xff]  ;;  %v684_v14 = vld [vmem:[#allocation7 + $0x228] sm:$0xff] }
  0xfc   :  { %564 = vmatpush1.msra.mxu1 %v505_v9  ;;  %v537_v9 = vld [vmem:[#allocation9 + $0x190] sm:$0xff] }
  0xfd   :  { %v166_v18 = vcombine.low %v160_v15, %v162_v16  ;;  %v174_v19 = vcombine.high %v160_v15, %v162_v16  ;;  %v259_v20 = vcombine.low %v253_v12, %v255_v17  ;;  %v265_v21 = vcombine.high %v253_v12, %v255_v17  ;;  %v685_v12 = vld [vmem:[#allocation7 + $0x230] sm:$0xff]  ;;  %565 = vmatprep.subr.mxu1 %v504_v11  ;;  %v502_v15 = vld [vmem:[#allocation9 + $0x78] sm:$0xff]  ;;  %v683_v16 = vld [vmem:[#allocation7 + $0x220] sm:$0xff] }
  0xfe   :  { %566 = vmatpush1.msra.mxu1 %v503_v13  ;;  %v501_v17 = vld [vmem:[#allocation9 + $0x70] sm:$0xff]  ;;  %v536_v11 = vld [vmem:[#allocation9 + $0x188] sm:$0xff]  ;;  %v535_v13 = vld [vmem:[#allocation9 + $0x180] sm:$0xff] }
  0xff   :  { %168 = vst [vmem:[#allocation2 + $0x10] sm:$0x33] %v166_v18  ;;  %v1366_v22 = vrot.slane %v166_v18, 10  ;;  %177 = vst [vmem:[#allocation2 + $0x18] sm:$0x33] %v174_v19  ;;  %v1367_v23 = vrot.slane %v174_v19, 10  ;;  %567 = vmatprep.subr.mxu1 %v502_v15 }
 0x100   :  { %v260_v24 = vrot.slane %v259_v20, 6  ;;  %264 = vst [vmem:[#allocation2] sm:$0xcc] %v259_v20  ;;  %v266_v25 = vrot.slane %v265_v21, 6  ;;  %270 = vst [vmem:[#allocation2 + $0x8] sm:$0xcc] %v265_v21  ;;  %568 = vmatpush1.msra.mxu1 %v501_v17 }
 0x101   :  { %173 = vst [vmem:[#allocation2] sm:$0x33] %v1366_v22  ;;  %182 = vst [vmem:[#allocation2 + $0x8] sm:$0x33] %v1367_v23  ;;  %v682_v18 = vld [vmem:[#allocation7 + $0x218] sm:$0xff]  ;;  %v500_v19 = vld [vmem:[#allocation9 + $0x68] sm:$0xff] }
 0x102   :  { %262 = vst [vmem:[#allocation2 + $0x10] sm:$0xcc] %v260_v24  ;;  %268 = vst [vmem:[#allocation2 + $0x18] sm:$0xcc] %v266_v25  ;;  %v681_v20 = vld [vmem:[#allocation7 + $0x210] sm:$0xff]  ;;  %v499_v21 = vld [vmem:[#allocation9 + $0x60] sm:$0xff]  ;;  %569 = vmatprep.subr.mxu1 %v500_v19 }
 0x103   :  { %v680_v22 = vld [vmem:[#allocation7 + $0x208] sm:$0xff]  ;;  %v498_v23 = vld [vmem:[#allocation9 + $0x58] sm:$0xff]  ;;  %v679_v24 = vld [vmem:[#allocation7 + $0x200] sm:$0xff]  ;;  %570 = vmatpush1.msra.mxu1 %v499_v21 }
 0x104   :  { %v497_v25 = vld [vmem:[#allocation9 + $0x50] sm:$0xff]  ;;  %571 = vmatprep.subr.mxu1 %v498_v23  ;;  %v534_v15 = vld [vmem:[#allocation9 + $0x178] sm:$0xff]  ;;  %v532_v19 = vld [vmem:[#allocation9 + $0x168] sm:$0xff] }
 0x105   :  { %572 = vmatpush1.msra.mxu1 %v497_v25  ;;  %v533_v17 = vld [vmem:[#allocation9 + $0x170] sm:$0xff]  ;;  %v531_v21 = vld [vmem:[#allocation9 + $0x160] sm:$0xff]  ;;  %v530_v23 = vld [vmem:[#allocation9 + $0x158] sm:$0xff] }
 0x106   :  { %v529_v25 = vld [vmem:[#allocation9 + $0x150] sm:$0xff] }
 0x108   :  { %v344_v26 = vld [vmem:[#allocation2] sm:$0xff] }
 0x109   :  { %v1559_v27 = vld [vmem:[#allocation2 + $0x18] sm:$0xff]  ;;  %v271_v28 = vld [vmem:[#allocation2 + $0x10] sm:$0xff]  ;;  %v410_v29 = vcombine.high %v344_v26, %v344_v26 }
 0x10a   :  { %v272_v30 = vmax.f32 %v271_v28, 0.0  ;;  %v744_v33 = vcombine.high %v1559_v27, %v1559_v27  ;;  %v742_v28 = vld [vmem:[#allocation7 + $0x3f8] sm:$0xff] }
 0x10b   :  { %476 = vmatprep.mubr.f32.mxu0 %v410_v29  ;;  %v495_v29 = vld [vmem:[#allocation9 + $0x40] sm:$0xff] }
 0x10c   :  { %v273_v34 = vmin.f32 %v272_v30, 6.0  ;;  %477 = vmatmul.mubr.f32.vlgmr.msra.gmra.mxu0 %v344_v26  ;;  %v496_v26 = vld [vmem:[#allocation9 + $0x48] sm:$0xff]  ;;  %v741_v30 = vld [vmem:[#allocation7 + $0x3f0] sm:$0xff] }
 0x10d   :  { %747 = vmatpush1.msra.mxu0 %v709_v31  ;;  %810 = vmatprep.mubr.f32.mxu0 %v744_v33  ;;  %v494_v31 = vld [vmem:[#allocation9 + $0x38] sm:$0xff]  ;;  %v493_v33 = vld [vmem:[#allocation9 + $0x30] sm:$0xff] }
 0x10e   :  { %v275_v39 = vcombine.high %v273_v34, %v273_v34  ;;  %748 = vmatprep.subr.mxu0 %v708_v32  ;;  %v278_v44 = vsel %vm277_vm1, %v273_v34, 0.0  ;;  %v740_v32 = vld [vmem:[#allocation7 + $0x3e8] sm:$0xff]  ;;  %573 = vmatprep.subr.mxu1 %v496_v26  ;;  %v739_v34 = vld [vmem:[#allocation7 + $0x3e0] sm:$0xff] }
 0x10f   :  { %749 = vmatpush1.msra.mxu0 %v707_v35  ;;  %574 = vmatpush1.msra.mxu1 %v495_v29  ;;  %v492_v35 = vld [vmem:[#allocation9 + $0x28] sm:$0xff]  ;;  %v711_v26 = vld [vmem:[#allocation7 + $0x300] sm:$0xff] }
 0x110   :  { %v279_v45 = vsel %vm277_vm1, %v275_v39, 0.0  ;;  %750 = vmatprep.subr.mxu0 %v706_v38  ;;  %575 = vmatprep.subr.mxu1 %v494_v31  ;;  %v737_v38 = vld [vmem:[#allocation7 + $0x3d0] sm:$0xff]  ;;  %v490_v39 = vld [vmem:[#allocation9 + $0x18] sm:$0xff]  ;;  %v528_v29 = vld [vmem:[#allocation9 + $0x148] sm:$0xff] }
 0x111   :  { %v280_v47 = vadd.f32 %v279_v45, %v278_v44  ;;  %751 = vmatpush1.msra.mxu0 %v705_v41  ;;  %576 = vmatpush1.msra.mxu1 %v493_v33  ;;  %v489_v41 = vld [vmem:[#allocation9 + $0x10] sm:$0xff]  ;;  %v734_v44 = vld [vmem:[#allocation7 + $0x3b8] sm:$0xff]  ;;  %v487_v45 = vld [vmem:[#allocation9] sm:$0xff] }
 0x112   :  { %752 = vmatprep.subr.mxu0 %v704_v43  ;;  %577 = vmatprep.subr.mxu1 %v492_v35  ;;  %v488_v43 = vld [vmem:[#allocation9 + $0x8] sm:$0xff]  ;;  %v1042_v31 = vld [vmem:[#allocation7 + $0x4f0] sm:$0xff]  ;;  %v1040_v35 = vld [vmem:[#allocation7 + $0x4e0] sm:$0xff] }
 0x113   :  { %281 = vadd.xlane.f32.xlu0 %v280_v47  ;;  %753 = vmatpush1.msra.mxu0 %v703_v46  ;;  %v733_v46 = vld [vmem:[#allocation7 + $0x3b0] sm:$0xff]  ;;  %v550_v47 = vld [vmem:[#allocation9 + $0x1f8] sm:$0xff]  ;;  %v1041_v33 = vld [vmem:[#allocation7 + $0x4e8] sm:$0xff] }
 0x114   :  { %754 = vmatprep.subr.mxu0 %v702_v49  ;;  %578 = vmatpush1.msra.mxu1 %v491_v37  ;;  %v549_v49 = vld [vmem:[#allocation9 + $0x1f0] sm:$0xff]  ;;  %v1039_v37 = vld [vmem:[#allocation7 + $0x4d8] sm:$0xff] }
 0x115   :  { %755 = vmatpush1.msra.mxu0 %v701_v51  ;;  %579 = vmatprep.subr.mxu1 %v490_v39  ;;  %v548_v51 = vld [vmem:[#allocation9 + $0x1e8] sm:$0xff]  ;;  %v1038_v39 = vld [vmem:[#allocation7 + $0x4d0] sm:$0xff] }
 0x116   :  { %756 = vmatprep.subr.mxu0 %v700_v53  ;;  %580 = vmatpush1.msra.mxu1 %v489_v41  ;;  %v547_v53 = vld [vmem:[#allocation9 + $0x1e0] sm:$0xff]  ;;  %v1037_v41 = vld [vmem:[#allocation7 + $0x4c8] sm:$0xff] }
 0x117   :  { %757 = vmatpush1.msra.mxu0 %v699_v55  ;;  %581 = vmatprep.subr.mxu1 %v488_v43  ;;  %v546_v55 = vld [vmem:[#allocation9 + $0x1d8] sm:$0xff]  ;;  %v1036_v43 = vld [vmem:[#allocation7 + $0x4c0] sm:$0xff] }
 0x118   :  { %758 = vmatprep.subr.mxu0 %v698_v57  ;;  %582 = vmatpush1.msra.mxu1 %v487_v45  ;;  %v545_v57 = vld [vmem:[#allocation9 + $0x1d0] sm:$0xff] }
 0x119   :  { %759 = vmatpush1.msra.mxu0 %v697_v58  ;;  %583 = vmatprep.subr.mxu1 %v550_v47  ;;  %v727_v58 = vld [vmem:[#allocation7 + $0x380] sm:$0xff]  ;;  %v521_v45 = vld [vmem:[#allocation9 + $0x110] sm:$0xff]  ;;  %v520_v47 = vld [vmem:[#allocation9 + $0x108] sm:$0xff] }
 0x11a   :  { %760 = vmatprep.subr.mxu0 %v696_v59  ;;  %584 = vmatpush2.msra.mxu1 %v549_v49  ;;  %v544_v59 = vld [vmem:[#allocation9 + $0x1c8] sm:$0xff]  ;;  %v519_v49 = vld [vmem:[#allocation9 + $0x100] sm:$0xff] }
 0x11b   :  { %761 = vmatpush1.msra.mxu0 %v695_v60  ;;  %585 = vmatprep.subr.mxu1 %v548_v51  ;;  %v726_v60 = vld [vmem:[#allocation7 + $0x378] sm:$0xff] }
 0x11c   :  { %762 = vmatprep.subr.mxu0 %v694_v61  ;;  %586 = vmatpush2.msra.mxu1 %v547_v53  ;;  %v543_v61 = vld [vmem:[#allocation9 + $0x1c0] sm:$0xff]  ;;  %v853_v51 = vld [vmem:[#allocation9 + $0x2f8] sm:$0xff]  ;;  %v1030_v53 = vld [vmem:[#allocation7 + $0x490] sm:$0xff] }
 0x11d   :  { %763 = vmatpush1.msra.mxu0 %v693_v62  ;;  %587 = vmatprep.subr.mxu1 %v546_v55  ;;  %v725_v62 = vld [vmem:[#allocation7 + $0x370] sm:$0xff]  ;;  %v1028_v55 = vld [vmem:[#allocation7 + $0x480] sm:$0xff] }
 0x11e   :  { %764 = vmatprep.subr.mxu0 %v692_v63  ;;  %588 = vmatpush2.msra.mxu1 %v545_v57  ;;  %v542_v63 = vld [vmem:[#allocation9 + $0x1b8] sm:$0xff]  ;;  %v1026_v57 = vld [vmem:[#allocation7 + $0x470] sm:$0xff] }
 0x11f   :  { %765 = vmatpush1.msra.mxu0 %v691_v0  ;;  %v724_v0 = vld [vmem:[#allocation7 + $0x368] sm:$0xff]  ;;  %589 = vmatprep.subr.mxu1 %v544_v59  ;;  %v1024_v59 = vld [vmem:[#allocation7 + $0x460] sm:$0xff] }
 0x120   :  { %766 = vmatprep.subr.mxu0 %v690_v2  ;;  %v723_v2 = vld [vmem:[#allocation7 + $0x360] sm:$0xff]  ;;  %590 = vmatpush2.msra.mxu1 %v543_v61  ;;  %v1022_v61 = vld [vmem:[#allocation7 + $0x450] sm:$0xff] }
 0x121   :  { %767 = vmatpush1.msra.mxu0 %v689_v4  ;;  %v722_v4 = vld [vmem:[#allocation7 + $0x358] sm:$0xff]  ;;  %591 = vmatprep.subr.mxu1 %v542_v63  ;;  %v1020_v63 = vld [vmem:[#allocation7 + $0x440] sm:$0xff] }
 0x122   :  { %768 = vmatprep.subr.mxu0 %v688_v6  ;;  %v721_v6 = vld [vmem:[#allocation7 + $0x350] sm:$0xff]  ;;  %592 = vmatpush2.msra.mxu1 %v541_v1 }
 0x123   :  { %769 = vmatpush1.msra.mxu0 %v687_v8  ;;  %v720_v8 = vld [vmem:[#allocation7 + $0x348] sm:$0xff]  ;;  %593 = vmatprep.subr.mxu1 %v540_v3  ;;  %v1018_v1 = vld [vmem:[#allocation7 + $0x430] sm:$0xff]  ;;  %v1016_v3 = vld [vmem:[#allocation7 + $0x420] sm:$0xff] }
 0x124   :  { %770 = vmatprep.subr.mxu0 %v686_v10  ;;  %v719_v10 = vld [vmem:[#allocation7 + $0x340] sm:$0xff]  ;;  %594 = vmatpush2.msra.mxu1 %v539_v5  ;;  %v1014_v5 = vld [vmem:[#allocation7 + $0x410] sm:$0xff] }
 0x125   :  { %771 = vmatpush1.msra.mxu0 %v685_v12  ;;  %v718_v12 = vld [vmem:[#allocation7 + $0x338] sm:$0xff]  ;;  %595 = vmatprep.subr.mxu1 %v538_v7  ;;  %v1012_v7 = vld [vmem:[#allocation7 + $0x400] sm:$0xff] }
 0x126   :  { %772 = vmatprep.subr.mxu0 %v684_v14  ;;  %v717_v14 = vld [vmem:[#allocation7 + $0x330] sm:$0xff]  ;;  %596 = vmatpush2.msra.mxu1 %v537_v9 }
 0x127   :  { %773 = vmatpush1.msra.mxu0 %v683_v16  ;;  %v716_v16 = vld [vmem:[#allocation7 + $0x328] sm:$0xff]  ;;  %597 = vmatprep.subr.mxu1 %v536_v11  ;;  %v1074_v9 = vld [vmem:[#allocation7 + $0x5f0] sm:$0xff]  ;;  %v1072_v11 = vld [vmem:[#allocation7 + $0x5e0] sm:$0xff] }
 0x128   :  { %774 = vmatprep.subr.mxu0 %v682_v18  ;;  %v715_v18 = vld [vmem:[#allocation7 + $0x320] sm:$0xff]  ;;  %598 = vmatpush2.msra.mxu1 %v535_v13  ;;  %v1070_v13 = vld [vmem:[#allocation7 + $0x5d0] sm:$0xff] }
 0x129   :  { %775 = vmatpush1.msra.mxu0 %v681_v20  ;;  %v714_v20 = vld [vmem:[#allocation7 + $0x318] sm:$0xff]  ;;  %599 = vmatprep.subr.mxu1 %v534_v15  ;;  %v1068_v15 = vld [vmem:[#allocation7 + $0x5c0] sm:$0xff] }
 0x12a   :  { %776 = vmatprep.subr.mxu0 %v680_v22  ;;  %v713_v22 = vld [vmem:[#allocation7 + $0x310] sm:$0xff]  ;;  %600 = vmatpush2.msra.mxu1 %v533_v17 }
 0x12b   :  { %777 = vmatpush1.msra.mxu0 %v679_v24  ;;  %v712_v24 = vld [vmem:[#allocation7 + $0x308] sm:$0xff]  ;;  %601 = vmatprep.subr.mxu1 %v532_v19  ;;  %v1066_v17 = vld [vmem:[#allocation7 + $0x5b0] sm:$0xff]  ;;  %v1064_v19 = vld [vmem:[#allocation7 + $0x5a0] sm:$0xff] }
 0x12c   :  { %778 = vmatprep.subr.mxu0 %v742_v28  ;;  %v1563_v28 = vld [vmem:[#allocation2 + $0x8] sm:$0xff]  ;;  %602 = vmatpush2.msra.mxu1 %v531_v21  ;;  %v1062_v21 = vld [vmem:[#allocation7 + $0x590] sm:$0xff] }
 0x12d   :  { %779 = vmatpush2.msra.mxu0 %v741_v30  ;;  %v1043_v30 = vld [vmem:[#allocation7 + $0x4f8] sm:$0xff]  ;;  %603 = vmatprep.subr.mxu1 %v530_v23  ;;  %v1060_v23 = vld [vmem:[#allocation7 + $0x580] sm:$0xff] }
 0x12e   :  { %780 = vmatprep.subr.mxu0 %v740_v32  ;;  %604 = vmatpush2.msra.mxu1 %v529_v25  ;;  %v1077_v32 = vcombine.high %v1563_v28, %v1563_v28  ;;  %v1058_v25 = vld [vmem:[#allocation7 + $0x570] sm:$0xff] }
 0x12f   :  { %781 = vmatpush2.msra.mxu0 %v739_v34  ;;  %605 = vmatprep.subr.mxu1 %v528_v29  ;;  %v527_v34 = vld [vmem:[#allocation9 + $0x140] sm:$0xff] }
 0x130   :  { %782 = vmatprep.subr.mxu0 %v738_v36  ;;  %v526_v36 = vld [vmem:[#allocation9 + $0x138] sm:$0xff]  ;;  %606 = vmatpush2.msra.mxu1 %v527_v34  ;;  %v1056_v29 = vld [vmem:[#allocation7 + $0x560] sm:$0xff] }
 0x131   :  { %783 = vmatpush2.msra.mxu0 %v737_v38  ;;  %v525_v38 = vld [vmem:[#allocation9 + $0x130] sm:$0xff]  ;;  %607 = vmatprep.subr.mxu1 %v526_v36  ;;  %v1051_v34 = vld [vmem:[#allocation7 + $0x538] sm:$0xff]  ;;  %v1049_v36 = vld [vmem:[#allocation7 + $0x528] sm:$0xff] }
 0x132   :  { %784 = vmatprep.subr.mxu0 %v736_v40  ;;  %v524_v40 = vld [vmem:[#allocation9 + $0x128] sm:$0xff]  ;;  %608 = vmatpush2.msra.mxu1 %v525_v38  ;;  %v1047_v38 = vld [vmem:[#allocation7 + $0x518] sm:$0xff] }
 0x133   :  { %785 = vmatpush2.msra.mxu0 %v735_v42  ;;  %v523_v42 = vld [vmem:[#allocation9 + $0x120] sm:$0xff]  ;;  %609 = vmatprep.subr.mxu1 %v524_v40  ;;  %v1045_v40 = vld [vmem:[#allocation7 + $0x508] sm:$0xff] }
 0x134   :  { %786 = vmatprep.subr.mxu0 %v734_v44  ;;  %v522_v44 = vld [vmem:[#allocation9 + $0x118] sm:$0xff]  ;;  %610 = vmatpush2.msra.mxu1 %v523_v42  ;;  %v1493_v42 = vmov 269488144  }
 0x135   :  { %787 = vmatpush2.msra.mxu0 %v733_v46  ;;  %v1034_v46 = vld [vmem:[#allocation7 + $0x4b0] sm:$0xff]  ;;  %611 = vmatprep.subr.mxu1 %v522_v44  ;;  %v289_v44 = vlaneseq }
 0x136   :  { %788 = vmatprep.subr.mxu0 %v732_v48  ;;  %v1033_v48 = vld [vmem:[#allocation7 + $0x4a8] sm:$0xff]  ;;  %612 = vmatpush2.msra.mxu1 %v521_v45 }
 0x137   :  { %789 = vmatpush2.msra.mxu0 %v731_v50  ;;  %v1032_v50 = vld [vmem:[#allocation7 + $0x4a0] sm:$0xff]  ;;  %613 = vmatprep.subr.mxu1 %v520_v47  ;;  %v290_v47 = vshrl.u32 %v289_v44, 7 }
 0x138   :  { %790 = vmatprep.subr.mxu0 %v730_v52  ;;  %v1031_v52 = vld [vmem:[#allocation7 + $0x498] sm:$0xff]  ;;  %614 = vmatpush2.msra.mxu1 %v519_v49  ;;  %v1495_v49 = vmov 1983009808   ;;  %v830_v44 = vld [vmem:[#allocation9 + $0x240] sm:$0xff] }
 0x139   :  { %791 = vmatpush2.msra.mxu0 %v729_v54  ;;  %v1029_v54 = vld [vmem:[#allocation7 + $0x488] sm:$0xff]  ;;  %886 = vmatprep.subr.mxu1 %v853_v51 }
 0x13a   :  { %792 = vmatprep.subr.mxu0 %v728_v56  ;;  %v1027_v56 = vld [vmem:[#allocation7 + $0x478] sm:$0xff] }
 0x13b   :  { %793 = vmatpush2.msra.mxu0 %v727_v58  ;;  %v1025_v58 = vld [vmem:[#allocation7 + $0x468] sm:$0xff] }
 0x13c   :  { %794 = vmatprep.subr.mxu0 %v726_v60  ;;  %v1023_v60 = vld [vmem:[#allocation7 + $0x458] sm:$0xff] }
 0x13d   :  { %795 = vmatpush2.msra.mxu0 %v725_v62  ;;  %v1021_v62 = vld [vmem:[#allocation7 + $0x448] sm:$0xff] }
 0x13e   :  { %796 = vmatprep.subr.mxu0 %v724_v0  ;;  %v1019_v0 = vld [vmem:[#allocation7 + $0x438] sm:$0xff] }
 0x13f   :  { %797 = vmatpush2.msra.mxu0 %v723_v2  ;;  %v1017_v2 = vld [vmem:[#allocation7 + $0x428] sm:$0xff] }
 0x140   :  { %798 = vmatprep.subr.mxu0 %v722_v4  ;;  %v1015_v4 = vld [vmem:[#allocation7 + $0x418] sm:$0xff] }
 0x141   :  { %799 = vmatpush2.msra.mxu0 %v721_v6  ;;  %v1013_v6 = vld [vmem:[#allocation7 + $0x408] sm:$0xff] }
 0x142   :  { %800 = vmatprep.subr.mxu0 %v720_v8  ;;  %v1075_v8 = vld [vmem:[#allocation7 + $0x5f8] sm:$0xff] }
 0x143   :  { %801 = vmatpush2.msra.mxu0 %v719_v10  ;;  %v1073_v10 = vld [vmem:[#allocation7 + $0x5e8] sm:$0xff] }
 0x144   :  { %802 = vmatprep.subr.mxu0 %v718_v12  ;;  %v1071_v12 = vld [vmem:[#allocation7 + $0x5d8] sm:$0xff] }
 0x145   :  { %803 = vmatpush2.msra.mxu0 %v717_v14  ;;  %v1069_v14 = vld [vmem:[#allocation7 + $0x5c8] sm:$0xff] }
 0x146   :  { %804 = vmatprep.subr.mxu0 %v716_v16  ;;  %v1067_v16 = vld [vmem:[#allocation7 + $0x5b8] sm:$0xff] }
 0x147   :  { %805 = vmatpush2.msra.mxu0 %v715_v18  ;;  %v1065_v18 = vld [vmem:[#allocation7 + $0x5a8] sm:$0xff] }
 0x148   :  { %806 = vmatprep.subr.mxu0 %v714_v20  ;;  %v1063_v20 = vld [vmem:[#allocation7 + $0x598] sm:$0xff] }
 0x149   :  { %807 = vmatpush2.msra.mxu0 %v713_v22  ;;  %v1061_v22 = vld [vmem:[#allocation7 + $0x588] sm:$0xff] }
 0x14a   :  { %808 = vmatprep.subr.mxu0 %v712_v24  ;;  %v1059_v24 = vld [vmem:[#allocation7 + $0x578] sm:$0xff] }
 0x14b   :  { %809 = vmatpush2.msra.mxu0 %v711_v26  ;;  %v1057_v26 = vld [vmem:[#allocation7 + $0x568] sm:$0xff] }
 0x14c   :  { %811 = vmatmul.mubr.f32.vlgmr.msra.gmra.mxu0 %v1559_v27  ;;  %1079 = vmatprep.subr.mxu0 %v1043_v30  ;;  %v1035_v27 = vld [vmem:[#allocation7 + $0x4b8] sm:$0xff] }
 0x14d   :  { %1080 = vmatpush1.msra.mxu0 %v1042_v31  ;;  %1143 = vmatprep.mubr.f32.mxu0 %v1077_v32  ;;  %v1055_v30 = vld [vmem:[#allocation7 + $0x558] sm:$0xff]  ;;  %v1054_v31 = vld [vmem:[#allocation7 + $0x550] sm:$0xff]  ;;  %v1053_v32 = vld [vmem:[#allocation7 + $0x548] sm:$0xff] }
 0x14e   :  { %1081 = vmatprep.subr.mxu0 %v1041_v33  ;;  %v1052_v33 = vld [vmem:[#allocation7 + $0x540] sm:$0xff] }
 0x14f   :  { %1082 = vmatpush1.msra.mxu0 %v1040_v35  ;;  %v1050_v35 = vld [vmem:[#allocation7 + $0x530] sm:$0xff] }
 0x150   :  { %1083 = vmatprep.subr.mxu0 %v1039_v37  ;;  %v1048_v37 = vld [vmem:[#allocation7 + $0x520] sm:$0xff] }
 0x151   :  { %1084 = vmatpush1.msra.mxu0 %v1038_v39  ;;  %v1046_v39 = vld [vmem:[#allocation7 + $0x510] sm:$0xff] }
 0x152   :  { %1085 = vmatprep.subr.mxu0 %v1037_v41  ;;  %v1044_v41 = vld [vmem:[#allocation7 + $0x500] sm:$0xff] }
 0x153   :  { %1086 = vmatpush1.msra.mxu0 %v1036_v43  ;;  %v287_v43 = vunpack.c.l.s4 %v1493_v42  ;;  %v832_v42 = vld [vmem:[#allocation9 + $0x250] sm:$0xff] }
 0x154   :  { %1087 = vmatprep.subr.mxu0 %v1035_v27  ;;  %v1494_v27 = vmov 842150450  }
 0x155   :  { %1088 = vmatpush1.msra.mxu0 %v1034_v46  ;;  %v294_v45 = vunpack.c.l.s4 %v1494_v27  ;;  %v288_v46 = vunpack.c.0.s8 %v287_v43  ;;  %v831_v43 = vld [vmem:[#allocation9 + $0x248] sm:$0xff]  ;;  %v829_v27 = vld [vmem:[#allocation9 + $0x238] sm:$0xff] }
 0x156   :  { %1089 = vmatprep.subr.mxu0 %v1033_v48 }
 0x157   :  { %1090 = vmatpush1.msra.mxu0 %v1032_v50  ;;  %v295_v48 = vunpack.c.0.s8 %v294_v45  ;;  %v317_v50 = vunpack.c.l.s4 %v1495_v49  ;;  %v291_v51 = vsub.s32 %v288_v46, %v290_v47  ;;  %v828_v45 = vld [vmem:[#allocation9 + $0x230] sm:$0xff]  ;;  %v827_v46 = vld [vmem:[#allocation9 + $0x228] sm:$0xff] }
 0x158   :  { %1091 = vmatprep.subr.mxu0 %v1031_v52  ;;  %v824_v49 = vld [vmem:[#allocation9 + $0x210] sm:$0xff] }
 0x159   :  { %1092 = vmatpush1.msra.mxu0 %v1030_v53  ;;  %v298_v52 = vsub.s32 %v295_v48, %v290_v47  ;;  %v318_v53 = vunpack.c.0.s8 %v317_v50  ;;  %v825_v48 = vld [vmem:[#allocation9 + $0x218] sm:$0xff]  ;;  %v823_v50 = vld [vmem:[#allocation9 + $0x208] sm:$0xff] }
 0x15a   :  { %1093 = vmatprep.subr.mxu0 %v1029_v54 }
 0x15b   :  { %1094 = vmatpush1.msra.mxu0 %v1028_v55 }
 0x15c   :  { %1095 = vmatprep.subr.mxu0 %v1027_v56  ;;  %v302_v56 = vld [vmem:[#allocation3] sm:$0x3] }
 0x15d   :  { %1096 = vmatpush1.msra.mxu0 %v1026_v57  ;;  %v304_v57 = vld [vmem:[#allocation3 + $0x10] sm:$0x3] }
 0x15e   :  { %1097 = vmatprep.subr.mxu0 %v1025_v58  ;;  %v1571_v58 = vstv %s1364_s1 }
 0x15f   :  { %1098 = vmatpush1.msra.mxu0 %v1024_v59  ;;  %v1573_v59 = vsub.s32 %v318_v53, %v290_v47  ;;  %v826_v47 = vld [vmem:[#allocation9 + $0x220] sm:$0xff]  ;;  %v884_v53 = vld [vmem:[#allocation9 + $0x3f0] sm:$0xff] }
 0x160   :  { %1099 = vmatprep.subr.mxu0 %v1023_v60 }
 0x161   :  { %1100 = vmatpush1.msra.mxu0 %v1022_v61 }
 0x162   :  { %1101 = vmatprep.subr.mxu0 %v1021_v62  ;;  %v303_v62 = vld [vmem:[#allocation3 + $0x8] sm:$0x3] }
 0x163   :  { %1102 = vmatpush1.msra.mxu0 %v1020_v63  ;;  %v305_v63 = vld [vmem:[#allocation3 + $0x18] sm:$0x3] }
 0x164   :  { %1103 = vmatprep.subr.mxu0 %v1019_v0 }
 0x165   :  { %1104 = vmatpush1.msra.mxu0 %v1018_v1 }
 0x166   :  { %1105 = vmatprep.subr.mxu0 %v1017_v2 }
 0x167   :  { %1106 = vmatpush1.msra.mxu0 %v1016_v3 }
 0x168   :  { %1107 = vmatprep.subr.mxu0 %v1015_v4 }
 0x169   :  { %1108 = vmatpush1.msra.mxu0 %v1014_v5 }
 0x16a   :  { %1109 = vmatprep.subr.mxu0 %v1013_v6 }
 0x16b   :  { %1110 = vmatpush1.msra.mxu0 %v1012_v7 }
 0x16c   :  { %1111 = vmatprep.subr.mxu0 %v1075_v8 }
 0x16d   :  { %1112 = vmatpush2.msra.mxu0 %v1074_v9 }
 0x16e   :  { %1113 = vmatprep.subr.mxu0 %v1073_v10 }
 0x16f   :  { %1114 = vmatpush2.msra.mxu0 %v1072_v11 }
 0x170   :  { %1115 = vmatprep.subr.mxu0 %v1071_v12 }
 0x171   :  { %1116 = vmatpush2.msra.mxu0 %v1070_v13 }
 0x172   :  { %1117 = vmatprep.subr.mxu0 %v1069_v14 }
 0x173   :  { %1118 = vmatpush2.msra.mxu0 %v1068_v15 }
 0x174   :  { %1119 = vmatprep.subr.mxu0 %v1067_v16 }
 0x175   :  { %1120 = vmatpush2.msra.mxu0 %v1066_v17 }
 0x176   :  { %1121 = vmatprep.subr.mxu0 %v1065_v18 }
 0x177   :  { %1122 = vmatpush2.msra.mxu0 %v1064_v19 }
 0x178   :  { %1123 = vmatprep.subr.mxu0 %v1063_v20  ;;  %v852_v20 = vld [vmem:[#allocation9 + $0x2f0] sm:$0xff] }
 0x179   :  { %1124 = vmatpush2.msra.mxu0 %v1062_v21  ;;  %v851_v21 = vld [vmem:[#allocation9 + $0x2e8] sm:$0xff] }
 0x17a   :  { %1125 = vmatprep.subr.mxu0 %v1061_v22  ;;  %v850_v22 = vld [vmem:[#allocation9 + $0x2e0] sm:$0xff] }
 0x17b   :  { %1126 = vmatpush2.msra.mxu0 %v1060_v23  ;;  %v849_v23 = vld [vmem:[#allocation9 + $0x2d8] sm:$0xff] }
 0x17c   :  { %1127 = vmatprep.subr.mxu0 %v1059_v24  ;;  %v848_v24 = vld [vmem:[#allocation9 + $0x2d0] sm:$0xff] }
 0x17d   :  { %1128 = vmatpush2.msra.mxu0 %v1058_v25  ;;  %v847_v25 = vld [vmem:[#allocation9 + $0x2c8] sm:$0xff] }
 0x17e   :  { %1129 = vmatprep.subr.mxu0 %v1057_v26  ;;  %v846_v26 = vld [vmem:[#allocation9 + $0x2c0] sm:$0xff] }
 0x17f   :  { %1130 = vmatpush2.msra.mxu0 %v1056_v29  ;;  %v845_v29 = vld [vmem:[#allocation9 + $0x2b8] sm:$0xff] }
 0x180   :  { %1131 = vmatprep.subr.mxu0 %v1055_v30  ;;  %v844_v30 = vld [vmem:[#allocation9 + $0x2b0] sm:$0xff] }
 0x181   :  { %1132 = vmatpush2.msra.mxu0 %v1054_v31  ;;  %v843_v31 = vld [vmem:[#allocation9 + $0x2a8] sm:$0xff] }
 0x182   :  { %1133 = vmatprep.subr.mxu0 %v1053_v32  ;;  %v842_v32 = vld [vmem:[#allocation9 + $0x2a0] sm:$0xff] }
 0x183   :  { %1134 = vmatpush2.msra.mxu0 %v1052_v33  ;;  %v841_v33 = vld [vmem:[#allocation9 + $0x298] sm:$0xff] }
 0x184   :  { %1135 = vmatprep.subr.mxu0 %v1051_v34  ;;  %v840_v34 = vld [vmem:[#allocation9 + $0x290] sm:$0xff] }
 0x185   :  { %1136 = vmatpush2.msra.mxu0 %v1050_v35  ;;  %v839_v35 = vld [vmem:[#allocation9 + $0x288] sm:$0xff] }
 0x186   :  { %1137 = vmatprep.subr.mxu0 %v1049_v36  ;;  %v838_v36 = vld [vmem:[#allocation9 + $0x280] sm:$0xff] }
 0x187   :  { %1138 = vmatpush2.msra.mxu0 %v1048_v37  ;;  %v837_v37 = vld [vmem:[#allocation9 + $0x278] sm:$0xff] }
 0x188   :  { %1139 = vmatprep.subr.mxu0 %v1047_v38  ;;  %v836_v38 = vld [vmem:[#allocation9 + $0x270] sm:$0xff] }
 0x189   :  { %1140 = vmatpush2.msra.mxu0 %v1046_v39  ;;  %v835_v39 = vld [vmem:[#allocation9 + $0x268] sm:$0xff] }
 0x18a   :  { %1141 = vmatprep.subr.mxu0 %v1045_v40  ;;  %v834_v40 = vld [vmem:[#allocation9 + $0x260] sm:$0xff] }
 0x18b   :  { %1142 = vmatpush2.msra.mxu0 %v1044_v41  ;;  %v833_v41 = vld [vmem:[#allocation9 + $0x258] sm:$0xff] }
 0x18c   :  { %1144 = vmatmul.mubr.f32.vlgmr.msra.gmra.mxu0 %v1563_v28  ;;  %v1569_v28 = vstv %s78_s2 }
 0x18d   :  { %v307_v0 = vmul.f32 %v1569_v28, %v302_v56  ;;  %v309_v1 = vmul.f32 %v1569_v28, %v304_v57  ;;  %v308_v4 = vmul.f32 %v1569_v28, %v303_v62  ;;  %v310_v5 = vmul.f32 %v1569_v28, %v305_v63  ;;  %v881_v56 = vld [vmem:[#allocation9 + $0x3d8] sm:$0xff]  ;;  %v880_v57 = vld [vmem:[#allocation9 + $0x3d0] sm:$0xff] }
 0x18e   :  { %v877_v62 = vld [vmem:[#allocation9 + $0x3b8] sm:$0xff]  ;;  %v876_v63 = vld [vmem:[#allocation9 + $0x3b0] sm:$0xff] }
 0x19c   :  { %v282_v54 = vpop.xlane.xlu0 %281 }
 0x19d   :  { %v284_v55 = vmul.f32 0.00390625, %v282_v54  ;;  %v883_v54 = vld [vmem:[#allocation9 + $0x3e8] sm:$0xff] }
 0x19f   :  { %v292_v60 = vrot.slane %v284_v55, %v291_v51  ;;  %v299_v61 = vrot.slane %v284_v55, %v298_v52  ;;  %v822_v51 = vld [vmem:[#allocation9 + $0x200] sm:$0xff]  ;;  %v885_v52 = vld [vmem:[#allocation9 + $0x3f8] sm:$0xff] }
 0x1a0   :  { %v882_v55 = vld [vmem:[#allocation9 + $0x3e0] sm:$0xff] }
 0x1a1   :  { %v312_v2 = vmul.f32 %v1571_v58, %v292_v60  ;;  %v313_v3 = vmul.f32 %v1571_v58, %v299_v61  ;;  %v879_v60 = vld [vmem:[#allocation9 + $0x3c8] sm:$0xff]  ;;  %v878_v61 = vld [vmem:[#allocation9 + $0x3c0] sm:$0xff] }
 0x1a3   :  { %v322_v6 = vrot.slane %v312_v2, %v1573_v59  ;;  %v330_v7 = vrot.slane %v313_v3, %v1573_v59  ;;  %v873_v2 = vld [vmem:[#allocation9 + $0x398] sm:$0xff]  ;;  %v872_v3 = vld [vmem:[#allocation9 + $0x390] sm:$0xff] }
 0x1a5   :  { %v323_v8 = vcombine.high %v322_v6, %v322_v6  ;;  %v331_v9 = vcombine.high %v330_v7, %v330_v7  ;;  %v336_v10 = vadd.f32 %v322_v6, %v307_v0  ;;  %v338_v11 = vadd.f32 %v330_v7, %v309_v1  ;;  %v875_v0 = vld [vmem:[#allocation9 + $0x3a8] sm:$0xff]  ;;  %v874_v1 = vld [vmem:[#allocation9 + $0x3a0] sm:$0xff]  ;;  %v869_v6 = vld [vmem:[#allocation9 + $0x378] sm:$0xff] }
 0x1a6   :  { %v868_v7 = vld [vmem:[#allocation9 + $0x370] sm:$0xff] }
 0x1a7   :  { %v337_v12 = vadd.f32 %v323_v8, %v308_v4  ;;  %v339_v13 = vadd.f32 %v331_v9, %v310_v5  ;;  %340 = vst [vmem:[#allocation11] sm:$0x3] %v336_v10  ;;  %342 = vst [vmem:[#allocation11 + $0x10] sm:$0x3] %v338_v11  ;;  %v871_v4 = vld [vmem:[#allocation9 + $0x388] sm:$0xff]  ;;  %v870_v5 = vld [vmem:[#allocation9 + $0x380] sm:$0xff] }
 0x1a8   :  { %v867_v8 = vld [vmem:[#allocation9 + $0x368] sm:$0xff]  ;;  %v866_v9 = vld [vmem:[#allocation9 + $0x360] sm:$0xff]  ;;  %v865_v10 = vld [vmem:[#allocation9 + $0x358] sm:$0xff] }
 0x1a9   :  { %341 = vst [vmem:[#allocation11 + $0x8] sm:$0x3] %v337_v12  ;;  %343 = vst [vmem:[#allocation11 + $0x18] sm:$0x3] %v339_v13  ;;  %v864_v11 = vld [vmem:[#allocation9 + $0x350] sm:$0xff]  ;;  %v863_v12 = vld [vmem:[#allocation9 + $0x348] sm:$0xff] }
 0x1aa   :  { %v862_v13 = vld [vmem:[#allocation9 + $0x340] sm:$0xff] }
 0x1cc   :  { %v478_v14 = vpop.f32.mrf.mxu0 }
 0x1cd   :  { %v483_v15 = vmax.f32 %v478_v14, 0.0  ;;  %v861_v14 = vld [vmem:[#allocation9 + $0x338] sm:$0xff] }
 0x1ce   :  { %v480_v16 = vpop.f32.mrf.mxu0 }
 0x1cf   :  { %v484_v17 = vmax.f32 %v480_v16, 0.0  ;;  %v485_v19 = vmin.f32 %v483_v15, 6.0  ;;  %v860_v15 = vld [vmem:[#allocation9 + $0x330] sm:$0xff]  ;;  %v859_v16 = vld [vmem:[#allocation9 + $0x328] sm:$0xff] }
 0x1d1   :  { %v486_v18 = vmin.f32 %v484_v17, 6.0 }
 0x1d3   :  { %615 = vmatprep.mubr.f32.mxu1 %v486_v18  ;;  %v858_v18 = vld [vmem:[#allocation9 + $0x320] sm:$0xff] }
 0x1d4   :  { %616 = vmatmul.mubr.f32.vlgmr.msra.gmra.mxu1 %v485_v19  ;;  %v857_v19 = vld [vmem:[#allocation9 + $0x318] sm:$0xff] }
 0x1d5   :  { %887 = vmatpush1.msra.mxu1 %v852_v20 }
 0x1d6   :  { %888 = vmatprep.subr.mxu1 %v851_v21 }
 0x1d7   :  { %889 = vmatpush1.msra.mxu1 %v850_v22  ;;  %v856_v22 = vld [vmem:[#allocation9 + $0x310] sm:$0xff] }
 0x1d8   :  { %890 = vmatprep.subr.mxu1 %v849_v23 }
 0x1d9   :  { %891 = vmatpush1.msra.mxu1 %v848_v24  ;;  %v855_v24 = vld [vmem:[#allocation9 + $0x308] sm:$0xff] }
 0x1da   :  { %892 = vmatprep.subr.mxu1 %v847_v25  ;;  %v854_v25 = vld [vmem:[#allocation9 + $0x300] sm:$0xff] }
 0x1db   :  { %893 = vmatpush1.msra.mxu1 %v846_v26 }
 0x1dc   :  { %894 = vmatprep.subr.mxu1 %v845_v29  ;;  %v1186_v29 = vld [vmem:[#allocation9 + $0x4f8] sm:$0xff] }
 0x1dd   :  { %895 = vmatpush1.msra.mxu1 %v844_v30 }
 0x1de   :  { %896 = vmatprep.subr.mxu1 %v843_v31  ;;  %v1185_v31 = vld [vmem:[#allocation9 + $0x4f0] sm:$0xff] }
 0x1df   :  { %897 = vmatpush1.msra.mxu1 %v842_v32  ;;  %v1184_v32 = vld [vmem:[#allocation9 + $0x4e8] sm:$0xff] }
 0x1e0   :  { %898 = vmatprep.subr.mxu1 %v841_v33  ;;  %v1183_v33 = vld [vmem:[#allocation9 + $0x4e0] sm:$0xff] }
 0x1e1   :  { %899 = vmatpush1.msra.mxu1 %v840_v34  ;;  %v1182_v34 = vld [vmem:[#allocation9 + $0x4d8] sm:$0xff] }
 0x1e2   :  { %900 = vmatprep.subr.mxu1 %v839_v35  ;;  %v1181_v35 = vld [vmem:[#allocation9 + $0x4d0] sm:$0xff] }
 0x1e3   :  { %901 = vmatpush1.msra.mxu1 %v838_v36  ;;  %v1180_v36 = vld [vmem:[#allocation9 + $0x4c8] sm:$0xff] }
 0x1e4   :  { %902 = vmatprep.subr.mxu1 %v837_v37  ;;  %v1179_v37 = vld [vmem:[#allocation9 + $0x4c0] sm:$0xff] }
 0x1e5   :  { %903 = vmatpush1.msra.mxu1 %v836_v38  ;;  %v1178_v38 = vld [vmem:[#allocation9 + $0x4b8] sm:$0xff] }
 0x1e6   :  { %904 = vmatprep.subr.mxu1 %v835_v39  ;;  %v1177_v39 = vld [vmem:[#allocation9 + $0x4b0] sm:$0xff] }
 0x1e7   :  { %905 = vmatpush1.msra.mxu1 %v834_v40  ;;  %v1176_v40 = vld [vmem:[#allocation9 + $0x4a8] sm:$0xff] }
 0x1e8   :  { %906 = vmatprep.subr.mxu1 %v833_v41  ;;  %v1175_v41 = vld [vmem:[#allocation9 + $0x4a0] sm:$0xff] }
 0x1e9   :  { %907 = vmatpush1.msra.mxu1 %v832_v42  ;;  %v1174_v42 = vld [vmem:[#allocation9 + $0x498] sm:$0xff] }
 0x1ea   :  { %908 = vmatprep.subr.mxu1 %v831_v43  ;;  %v1173_v43 = vld [vmem:[#allocation9 + $0x490] sm:$0xff] }
 0x1eb   :  { %909 = vmatpush1.msra.mxu1 %v830_v44  ;;  %v1172_v44 = vld [vmem:[#allocation9 + $0x488] sm:$0xff] }
 0x1ec   :  { %910 = vmatprep.subr.mxu1 %v829_v27  ;;  %v1171_v27 = vld [vmem:[#allocation9 + $0x480] sm:$0xff] }
 0x1ed   :  { %911 = vmatpush1.msra.mxu1 %v828_v45  ;;  %v1170_v45 = vld [vmem:[#allocation9 + $0x478] sm:$0xff] }
 0x1ee   :  { %912 = vmatprep.subr.mxu1 %v827_v46  ;;  %v1169_v46 = vld [vmem:[#allocation9 + $0x470] sm:$0xff] }
 0x1ef   :  { %913 = vmatpush1.msra.mxu1 %v826_v47  ;;  %v1168_v47 = vld [vmem:[#allocation9 + $0x468] sm:$0xff] }
 0x1f0   :  { %914 = vmatprep.subr.mxu1 %v825_v48  ;;  %v1167_v48 = vld [vmem:[#allocation9 + $0x460] sm:$0xff] }
 0x1f1   :  { %915 = vmatpush1.msra.mxu1 %v824_v49  ;;  %v1166_v49 = vld [vmem:[#allocation9 + $0x458] sm:$0xff] }
 0x1f2   :  { %916 = vmatprep.subr.mxu1 %v823_v50  ;;  %v1165_v50 = vld [vmem:[#allocation9 + $0x450] sm:$0xff] }
 0x1f3   :  { %917 = vmatpush1.msra.mxu1 %v822_v51  ;;  %v1164_v51 = vld [vmem:[#allocation9 + $0x448] sm:$0xff] }
 0x1f4   :  { %918 = vmatprep.subr.mxu1 %v885_v52  ;;  %v1163_v52 = vld [vmem:[#allocation9 + $0x440] sm:$0xff] }
 0x1f5   :  { %919 = vmatpush2.msra.mxu1 %v884_v53  ;;  %v1162_v53 = vld [vmem:[#allocation9 + $0x438] sm:$0xff] }
 0x1f6   :  { %920 = vmatprep.subr.mxu1 %v883_v54  ;;  %v1161_v54 = vld [vmem:[#allocation9 + $0x430] sm:$0xff] }
 0x1f7   :  { %921 = vmatpush2.msra.mxu1 %v882_v55  ;;  %v1160_v55 = vld [vmem:[#allocation9 + $0x428] sm:$0xff] }
 0x1f8   :  { %922 = vmatprep.subr.mxu1 %v881_v56  ;;  %v1159_v56 = vld [vmem:[#allocation9 + $0x420] sm:$0xff] }
 0x1f9   :  { %923 = vmatpush2.msra.mxu1 %v880_v57  ;;  %v1158_v57 = vld [vmem:[#allocation9 + $0x418] sm:$0xff] }
 0x1fa   :  { %924 = vmatprep.subr.mxu1 %v879_v60  ;;  %v1157_v60 = vld [vmem:[#allocation9 + $0x410] sm:$0xff] }
 0x1fb   :  { %925 = vmatpush2.msra.mxu1 %v878_v61  ;;  %v1156_v61 = vld [vmem:[#allocation9 + $0x408] sm:$0xff] }
 0x1fc   :  { %926 = vmatprep.subr.mxu1 %v877_v62  ;;  %v1155_v62 = vld [vmem:[#allocation9 + $0x400] sm:$0xff] }
 0x1fd   :  { %927 = vmatpush2.msra.mxu1 %v876_v63  ;;  %v1218_v63 = vld [vmem:[#allocation9 + $0x5f8] sm:$0xff] }
 0x1fe   :  { %928 = vmatprep.subr.mxu1 %v875_v0  ;;  %v1217_v0 = vld [vmem:[#allocation9 + $0x5f0] sm:$0xff] }
 0x1ff   :  { %929 = vmatpush2.msra.mxu1 %v874_v1  ;;  %v1216_v1 = vld [vmem:[#allocation9 + $0x5e8] sm:$0xff] }
 0x200   :  { %930 = vmatprep.subr.mxu1 %v873_v2  ;;  %v1215_v2 = vld [vmem:[#allocation9 + $0x5e0] sm:$0xff] }
 0x201   :  { %931 = vmatpush2.msra.mxu1 %v872_v3  ;;  %v1214_v3 = vld [vmem:[#allocation9 + $0x5d8] sm:$0xff] }
 0x202   :  { %932 = vmatprep.subr.mxu1 %v871_v4  ;;  %v1213_v4 = vld [vmem:[#allocation9 + $0x5d0] sm:$0xff] }
 0x203   :  { %933 = vmatpush2.msra.mxu1 %v870_v5  ;;  %v1212_v5 = vld [vmem:[#allocation9 + $0x5c8] sm:$0xff] }
 0x204   :  { %934 = vmatprep.subr.mxu1 %v869_v6  ;;  %v1211_v6 = vld [vmem:[#allocation9 + $0x5c0] sm:$0xff] }
 0x205   :  { %935 = vmatpush2.msra.mxu1 %v868_v7  ;;  %v1210_v7 = vld [vmem:[#allocation9 + $0x5b8] sm:$0xff] }
 0x206   :  { %936 = vmatprep.subr.mxu1 %v867_v8  ;;  %v1209_v8 = vld [vmem:[#allocation9 + $0x5b0] sm:$0xff] }
 0x207   :  { %937 = vmatpush2.msra.mxu1 %v866_v9  ;;  %v1208_v9 = vld [vmem:[#allocation9 + $0x5a8] sm:$0xff] }
 0x208   :  { %938 = vmatprep.subr.mxu1 %v865_v10  ;;  %v1207_v10 = vld [vmem:[#allocation9 + $0x5a0] sm:$0xff] }
 0x209   :  { %939 = vmatpush2.msra.mxu1 %v864_v11  ;;  %v1206_v11 = vld [vmem:[#allocation9 + $0x598] sm:$0xff] }
 0x20a   :  { %940 = vmatprep.subr.mxu1 %v863_v12  ;;  %v1205_v12 = vld [vmem:[#allocation9 + $0x590] sm:$0xff] }
 0x20b   :  { %941 = vmatpush2.msra.mxu1 %v862_v13  ;;  %v1204_v13 = vld [vmem:[#allocation9 + $0x588] sm:$0xff] }
 0x20c   :  { %v812_v17 = vpop.f32.mrf.mxu0  ;;  %942 = vmatprep.subr.mxu1 %v861_v14  ;;  %v1203_v14 = vld [vmem:[#allocation9 + $0x580] sm:$0xff] }
 0x20d   :  { %943 = vmatpush2.msra.mxu1 %v860_v15  ;;  %v817_v20 = vmax.f32 %v812_v17, 0.0  ;;  %v1202_v15 = vld [vmem:[#allocation9 + $0x578] sm:$0xff]  ;;  %v1200_v17 = vld [vmem:[#allocation9 + $0x568] sm:$0xff] }
 0x20e   :  { %v814_v21 = vpop.f32.mrf.mxu0  ;;  %944 = vmatprep.subr.mxu1 %v859_v16  ;;  %v1201_v16 = vld [vmem:[#allocation9 + $0x570] sm:$0xff] }
 0x20f   :  { %v818_v23 = vmax.f32 %v814_v21, 0.0  ;;  %945 = vmatpush2.msra.mxu1 %v858_v18  ;;  %v819_v30 = vmin.f32 %v817_v20, 6.0  ;;  %v1199_v18 = vld [vmem:[#allocation9 + $0x560] sm:$0xff]  ;;  %v1197_v20 = vld [vmem:[#allocation9 + $0x550] sm:$0xff]  ;;  %v1196_v21 = vld [vmem:[#allocation9 + $0x548] sm:$0xff] }
 0x210   :  { %946 = vmatprep.subr.mxu1 %v857_v19  ;;  %v1198_v19 = vld [vmem:[#allocation9 + $0x558] sm:$0xff] }
 0x211   :  { %v820_v26 = vmin.f32 %v818_v23, 6.0  ;;  %947 = vmatpush2.msra.mxu1 %v856_v22  ;;  %v1195_v22 = vld [vmem:[#allocation9 + $0x540] sm:$0xff]  ;;  %v1194_v23 = vld [vmem:[#allocation9 + $0x538] sm:$0xff] }
 0x212   :  { %948 = vmatprep.subr.mxu1 %v855_v24  ;;  %v1193_v24 = vld [vmem:[#allocation9 + $0x530] sm:$0xff] }
 0x213   :  { %949 = vmatpush2.msra.mxu1 %v854_v25  ;;  %950 = vmatprep.mubr.f32.mxu1 %v820_v26  ;;  %v1192_v25 = vld [vmem:[#allocation9 + $0x528] sm:$0xff] }
 0x214   :  { %951 = vmatmul.mubr.f32.vlgmr.msra.gmra.mxu1 %v819_v30  ;;  %1219 = vmatprep.subr.mxu1 %v1186_v29  ;;  %v1191_v29 = vld [vmem:[#allocation9 + $0x520] sm:$0xff]  ;;  %v1190_v30 = vld [vmem:[#allocation9 + $0x518] sm:$0xff] }
 0x215   :  { %1220 = vmatpush1.msra.mxu1 %v1185_v31 }
 0x216   :  { %1221 = vmatprep.subr.mxu1 %v1184_v32 }
 0x217   :  { %1222 = vmatpush1.msra.mxu1 %v1183_v33  ;;  %v1189_v33 = vld [vmem:[#allocation9 + $0x510] sm:$0xff] }
 0x218   :  { %1223 = vmatprep.subr.mxu1 %v1182_v34 }
 0x219   :  { %1224 = vmatpush1.msra.mxu1 %v1181_v35  ;;  %v1188_v35 = vld [vmem:[#allocation9 + $0x508] sm:$0xff] }
 0x21a   :  { %1225 = vmatprep.subr.mxu1 %v1180_v36  ;;  %v1187_v36 = vld [vmem:[#allocation9 + $0x500] sm:$0xff] }
 0x21b   :  { %1226 = vmatpush1.msra.mxu1 %v1179_v37 }
 0x21c   :  { %1227 = vmatprep.subr.mxu1 %v1178_v38 }
 0x21d   :  { %1228 = vmatpush1.msra.mxu1 %v1177_v39 }
 0x21e   :  { %1229 = vmatprep.subr.mxu1 %v1176_v40 }
 0x21f   :  { %1230 = vmatpush1.msra.mxu1 %v1175_v41 }
 0x220   :  { %1231 = vmatprep.subr.mxu1 %v1174_v42 }
 0x221   :  { %1232 = vmatpush1.msra.mxu1 %v1173_v43  ;;  %v635_v43 = vld [vmem:[#allocation3] sm:$0xc] }
 0x222   :  { %1233 = vmatprep.subr.mxu1 %v1172_v44 }
 0x223   :  { %1234 = vmatpush1.msra.mxu1 %v1171_v27 }
 0x224   :  { %1235 = vmatprep.subr.mxu1 %v1170_v45  ;;  %v636_v45 = vld [vmem:[#allocation3 + $0x8] sm:$0xc] }
 0x225   :  { %1236 = vmatpush1.msra.mxu1 %v1169_v46  ;;  %v637_v46 = vld [vmem:[#allocation3 + $0x10] sm:$0xc] }
 0x226   :  { %1237 = vmatprep.subr.mxu1 %v1168_v47  ;;  %v639_v47 = vmul.f32 %v635_v43, %v1569_v28 }
 0x227   :  { %1238 = vmatpush1.msra.mxu1 %v1167_v48 }
 0x228   :  { %1239 = vmatprep.subr.mxu1 %v1166_v49 }
 0x229   :  { %1240 = vmatpush1.msra.mxu1 %v1165_v50  ;;  %v638_v50 = vld [vmem:[#allocation3 + $0x18] sm:$0xc] }
 0x22a   :  { %1241 = vmatprep.subr.mxu1 %v1164_v51  ;;  %v640_v51 = vmul.f32 %v636_v45, %v1569_v28 }
 0x22b   :  { %1242 = vmatpush1.msra.mxu1 %v1163_v52  ;;  %v641_v52 = vmul.f32 %v637_v46, %v1569_v28 }
 0x22c   :  { %1243 = vmatprep.subr.mxu1 %v1162_v53 }
 0x22d   :  { %1244 = vmatpush1.msra.mxu1 %v1161_v54 }
 0x22e   :  { %1245 = vmatprep.subr.mxu1 %v1160_v55  ;;  %v642_v55 = vmul.f32 %v638_v50, %v1569_v28 }
 0x22f   :  { %1246 = vmatpush1.msra.mxu1 %v1159_v56 }
 0x230   :  { %1247 = vmatprep.subr.mxu1 %v1158_v57 }
 0x231   :  { %1248 = vmatpush1.msra.mxu1 %v1157_v60 }
 0x232   :  { %1249 = vmatprep.subr.mxu1 %v1156_v61 }
 0x233   :  { %1250 = vmatpush1.msra.mxu1 %v1155_v62 }
 0x234   :  { %1251 = vmatprep.subr.mxu1 %v1218_v63 }
 0x235   :  { %1252 = vmatpush2.msra.mxu1 %v1217_v0 }
 0x236   :  { %1253 = vmatprep.subr.mxu1 %v1216_v1 }
 0x237   :  { %1254 = vmatpush2.msra.mxu1 %v1215_v2 }
 0x238   :  { %1255 = vmatprep.subr.mxu1 %v1214_v3 }
 0x239   :  { %1256 = vmatpush2.msra.mxu1 %v1213_v4  ;;  %v971_v4 = vld [vmem:[#allocation3 + $0x8] sm:$0x30] }
 0x23a   :  { %1257 = vmatprep.subr.mxu1 %v1212_v5 }
 0x23b   :  { %1258 = vmatpush2.msra.mxu1 %v1211_v6  ;;  %v970_v6 = vld [vmem:[#allocation3] sm:$0x30] }
 0x23c   :  { %1259 = vmatprep.subr.mxu1 %v1210_v7  ;;  %v973_v7 = vld [vmem:[#allocation3 + $0x18] sm:$0x30] }
 0x23d   :  { %1260 = vmatpush2.msra.mxu1 %v1209_v8 }
 0x23e   :  { %1261 = vmatprep.subr.mxu1 %v1208_v9  ;;  %v975_v9 = vmul.f32 %v971_v4, %v1569_v28 }
 0x23f   :  { %1262 = vmatpush2.msra.mxu1 %v1207_v10 }
 0x240   :  { %1263 = vmatprep.subr.mxu1 %v1206_v11  ;;  %v972_v11 = vld [vmem:[#allocation3 + $0x10] sm:$0x30] }
 0x241   :  { %1264 = vmatpush2.msra.mxu1 %v1205_v12  ;;  %v974_v12 = vmul.f32 %v970_v6, %v1569_v28 }
 0x242   :  { %1265 = vmatprep.subr.mxu1 %v1204_v13  ;;  %v977_v13 = vmul.f32 %v973_v7, %v1569_v28 }
 0x243   :  { %1266 = vmatpush2.msra.mxu1 %v1203_v14 }
 0x244   :  { %1267 = vmatprep.subr.mxu1 %v1202_v15 }
 0x245   :  { %1268 = vmatpush2.msra.mxu1 %v1201_v16  ;;  %v976_v16 = vmul.f32 %v972_v11, %v1569_v28 }
 0x246   :  { %1269 = vmatprep.subr.mxu1 %v1200_v17 }
 0x247   :  { %1270 = vmatpush2.msra.mxu1 %v1199_v18 }
 0x248   :  { %1271 = vmatprep.subr.mxu1 %v1198_v19 }
 0x249   :  { %1272 = vmatpush2.msra.mxu1 %v1197_v20 }
 0x24a   :  { %1273 = vmatprep.subr.mxu1 %v1196_v21 }
 0x24b   :  { %1274 = vmatpush2.msra.mxu1 %v1195_v22 }
 0x24c   :  { %v1145_v26 = vpop.f32.mrf.mxu0  ;;  %1275 = vmatprep.subr.mxu1 %v1194_v23 }
 0x24d   :  { %1276 = vmatpush2.msra.mxu1 %v1193_v24  ;;  %v1150_v31 = vmax.f32 %v1145_v26, 0.0 }
 0x24e   :  { %v1147_v32 = vpop.f32.mrf.mxu0  ;;  %1277 = vmatprep.subr.mxu1 %v1192_v25 }
 0x24f   :  { %v1151_v34 = vmax.f32 %v1147_v32, 0.0  ;;  %1278 = vmatpush2.msra.mxu1 %v1191_v29  ;;  %v1152_v38 = vmin.f32 %v1150_v31, 6.0 }
 0x250   :  { %1279 = vmatprep.subr.mxu1 %v1190_v30  ;;  %v1304_v30 = vld [vmem:[#allocation3 + $0x8] sm:$0xc0] }
 0x251   :  { %v1153_v37 = vmin.f32 %v1151_v34, 6.0  ;;  %1280 = vmatpush2.msra.mxu1 %v1189_v33  ;;  %v1303_v33 = vld [vmem:[#allocation3] sm:$0xc0]  ;;  %v1306_v34 = vld [vmem:[#allocation3 + $0x18] sm:$0xc0] }
 0x252   :  { %1281 = vmatprep.subr.mxu1 %v1188_v35  ;;  %v1308_v35 = vmul.f32 %v1304_v30, %v1569_v28 }
 0x253   :  { %1282 = vmatpush2.msra.mxu1 %v1187_v36  ;;  %1283 = vmatprep.mubr.f32.mxu1 %v1153_v37 }
 0x254   :  { %1284 = vmatmul.mubr.f32.vlgmr.msra.gmra.mxu1 %v1152_v38  ;;  %v1305_v38 = vld [vmem:[#allocation3 + $0x10] sm:$0xc0] }
 0x255   :  { %v1309_v43 = vmul.f32 %v1305_v38, %v1569_v28 }
 0x294   :  { %v617_v39 = vpop.f32.mrf.mxu1 }
 0x296   :  { %v619_v40 = vpop.f32.mrf.mxu1 }
 0x297   :  { %v624_v41 = vcombine.low %v617_v39, %v619_v40  ;;  %v1307_v39 = vmul.f32 %v1303_v33, %v1569_v28  ;;  %v1310_v40 = vmul.f32 %v1306_v34, %v1569_v28 }
 0x299   :  { %v631_v42 = vrot.slane %v624_v41, %v1573_v59 }
 0x29b   :  { %v632_v44 = vcombine.high %v631_v42, %v631_v42  ;;  %v643_v27 = vmul.f32 %v631_v42, %v1571_v58 }
 0x29d   :  { %v644_v48 = vmul.f32 %v632_v44, %v1571_v58  ;;  %v647_v49 = vcombine.low %v643_v27, %v643_v27 }
 0x29f   :  { %v654_v53 = vrot.slane %v647_v49, %v1573_v59  ;;  %v656_v54 = vcombine.low %v644_v48, %v644_v48 }
 0x2a1   :  { %v655_v56 = vcombine.high %v654_v53, %v654_v53  ;;  %v663_v57 = vrot.slane %v656_v54, %v1573_v59  ;;  %v669_v60 = vadd.f32 %v654_v53, %v639_v47 }
 0x2a3   :  { %v664_v61 = vcombine.high %v663_v57, %v663_v57  ;;  %v670_v62 = vadd.f32 %v655_v56, %v640_v51  ;;  %v671_v63 = vadd.f32 %v663_v57, %v641_v52  ;;  %673 = vst [vmem:[#allocation11] sm:$0xc] %v669_v60 }
 0x2a5   :  { %v672_v0 = vadd.f32 %v664_v61, %v642_v55  ;;  %674 = vst [vmem:[#allocation11 + $0x8] sm:$0xc] %v670_v62  ;;  %675 = vst [vmem:[#allocation11 + $0x10] sm:$0xc] %v671_v63 }
 0x2a7   :  { %676 = vst [vmem:[#allocation11 + $0x18] sm:$0xc] %v672_v0 }
 0x2d4   :  { %v952_v1 = vpop.f32.mrf.mxu1 }
 0x2d6   :  { %v954_v2 = vpop.f32.mrf.mxu1 }
 0x2d7   :  { %v959_v3 = vcombine.low %v952_v1, %v954_v2 }
 0x2d9   :  { %v966_v5 = vrot.slane %v959_v3, %v1573_v59 }
 0x2db   :  { %v967_v8 = vcombine.high %v966_v5, %v966_v5  ;;  %v978_v10 = vmul.f32 %v966_v5, %v1571_v58 }
 0x2dd   :  { %v979_v14 = vmul.f32 %v967_v8, %v1571_v58  ;;  %v988_v15 = vrot.slane %v978_v10, %v1573_v59 }
 0x2df   :  { %v989_v17 = vcombine.low %v988_v15, %v988_v15  ;;  %v996_v18 = vrot.slane %v979_v14, %v1573_v59  ;;  %v1003_v19 = vadd.f32 %v988_v15, %v975_v9 }
 0x2e1   :  { %v997_v20 = vcombine.low %v996_v18, %v996_v18  ;;  %v1002_v21 = vadd.f32 %v989_v17, %v974_v12  ;;  %v1005_v22 = vadd.f32 %v996_v18, %v977_v13  ;;  %1007 = vst [vmem:[#allocation11 + $0x8] sm:$0x30] %v1003_v19 }
 0x2e3   :  { %v1004_v23 = vadd.f32 %v997_v20, %v976_v16  ;;  %1006 = vst [vmem:[#allocation11] sm:$0x30] %v1002_v21  ;;  %1009 = vst [vmem:[#allocation11 + $0x18] sm:$0x30] %v1005_v22 }
 0x2e5   :  { %1008 = vst [vmem:[#allocation11 + $0x10] sm:$0x30] %v1004_v23 }
 0x314   :  { %v1285_v24 = vpop.f32.mrf.mxu1 }
 0x316   :  { %v1287_v25 = vpop.f32.mrf.mxu1 }
 0x317   :  { %v1292_v26 = vcombine.low %v1285_v24, %v1287_v25 }
 0x319   :  { %v1299_v29 = vrot.slane %v1292_v26, %v1573_v59 }
 0x31b   :  { %v1300_v31 = vcombine.high %v1299_v29, %v1299_v29  ;;  %v1311_v32 = vmul.f32 %v1299_v29, %v1571_v58 }
 0x31d   :  { %v1312_v36 = vmul.f32 %v1300_v31, %v1571_v58  ;;  %v1315_v37 = vcombine.low %v1311_v32, %v1311_v32 }
 0x31f   :  { %v1322_v41 = vrot.slane %v1315_v37, %v1573_v59  ;;  %v1324_v42 = vcombine.low %v1312_v36, %v1312_v36 }
 0x321   :  { %v1323_v44 = vcombine.low %v1322_v41, %v1322_v41  ;;  %v1331_v27 = vrot.slane %v1324_v42, %v1573_v59  ;;  %v1338_v45 = vadd.f32 %v1322_v41, %v1308_v35 }
 0x323   :  { %v1332_v46 = vcombine.low %v1331_v27, %v1331_v27  ;;  %v1337_v47 = vadd.f32 %v1323_v44, %v1307_v39  ;;  %v1340_v58 = vadd.f32 %v1331_v27, %v1310_v40  ;;  %1342 = vst [vmem:[#allocation11 + $0x8] sm:$0xc0] %v1338_v45 }
 0x325   :  { %v1339_v48 = vadd.f32 %v1332_v46, %v1309_v43  ;;  %1341 = vst [vmem:[#allocation11] sm:$0xc0] %v1337_v47  ;;  %1344 = vst [vmem:[#allocation11 + $0x18] sm:$0xc0] %v1340_v58 }
 0x327   :  { %1343 = vst [vmem:[#allocation11 + $0x10] sm:$0xc0] %v1339_v48 }
 0x328   :  { %1468 = shalt.err (!%p1465_p10)
}
 0x329   :  { %1356 = dma.vmem_to_hbm [thread:$0]  %s1351_s20, 512, %s1622_s6, [#allocation5], %s1487_s26, %s1487_s26, %s1488_s27  }
 0x32a   :  { %1483 = dma.done.wait [#allocation5], 512  }
 0x32b   :  { %1484 = vsyncadd [#allocation5], 4294966784 }
 0x32c   :  { %1360 = vsyncpa [#allocation4], 1 }
 0x32d   :  { %1361 = vsyncpa [#allocation8], 1 }
 0x32e   :  { %1362 = vsyncpa [#allocation5], 1 }
 0x32f   :  { %1363 = vsyncpa [#allocation6], 1 }

</bundles_post_ra>
